<compile_context>
chip_gen: v7x
topology: tpu7x:2x2x1
jax: 0.10.0
libtpu: 0.0.40
codegen_flags: <defaults>
</compile_context>

<pallas_src>
import functools

import jax
import jax.numpy as jnp
from jax.experimental import pallas as pl
from jax.experimental.pallas import tpu as pltpu

EPS = 1e-5


# ----------------------------------------------------------------------------
# small helpers
# ----------------------------------------------------------------------------
@functools.lru_cache(maxsize=None)
def _vmem_limit_bytes():
    cap = 128 * 1024 * 1024
    try:
        cap = int(getattr(pltpu.get_tpu_info(), "vmem_capacity_bytes", cap))
    except Exception:
        pass
    # leave headroom for compiler scratch / double buffering (matters on v7x: 64 MiB total)
    return int(min(64 * 1024 * 1024, cap * 3 // 4))


def _cparams(dims):
    return pltpu.CompilerParams(dimension_semantics=dims,
                                vmem_limit_bytes=_vmem_limit_bytes())


def _round_up(x, m):
    return (x + m - 1) // m * m


def _choose_rows(n_rows, requested=256):
    """Pick a row tile. Prefer one that divides n_rows exactly (no pad copy)."""
    requested = max(8, (requested // 8) * 8)
    if n_rows <= requested:
        return n_rows, n_rows            # single full-extent block
    for t in range(requested, 7, -8):
        if n_rows % t == 0:
            return t, n_rows
    return requested, _round_up(n_rows, requested)   # fallback: pad


def _choose_ff_tile(F, requested):
    requested = min(requested, F)
    if requested >= F:
        return F
    requested = max(128, (requested // 128) * 128)
    for t in range(requested, 127, -128):
        if F % t == 0:
            return t
    return F


def _pad_rows(x, rows):
    pad = rows - x.shape[0]
    if pad == 0:
        return x
    return jnp.pad(x, ((0, pad), (0, 0)))


def _layernorm_f32(x_f32, g_ref, b_ref):
    mean = jnp.mean(x_f32, axis=-1, keepdims=True)
    c = x_f32 - mean
    var = jnp.mean(c * c, axis=-1, keepdims=True)
    normed = c * jax.lax.rsqrt(var + EPS)
    return normed * g_ref[...].astype(jnp.float32) + b_ref[...].astype(jnp.float32)


# ----------------------------------------------------------------------------
# Kernel 1: pre-norm LayerNorm fused with the QKV projection.
#           The attention scale 1/sqrt(head_dim) is folded into Q here (hoisted
#           out of the flash kernel's kv loop).
# ----------------------------------------------------------------------------
def _ln_qkv_kernel(x_ref, g_ref, b_ref, w_ref, wb_ref, q_ref, k_ref, v_ref,
                   *, d_model, q_scale):
    y = _layernorm_f32(x_ref[...].astype(jnp.float32), g_ref, b_ref)
    qkv = jnp.dot(y.astype(w_ref.dtype), w_ref[...],
                  preferred_element_type=jnp.float32)
    qkv = qkv + wb_ref[...].astype(jnp.float32)
    q_ref[...] = (qkv[:, :d_model] * q_scale).astype(q_ref.dtype)
    k_ref[...] = qkv[:, d_model:2 * d_model].astype(k_ref.dtype)
    v_ref[...] = qkv[:, 2 * d_model:].astype(v_ref.dtype)


def ln_qkv_proj(x, gamma, beta, w_qkv, b_qkv, *, q_scale=1.0, tr=256):
    R, D = x.shape
    tr, Rp = _choose_rows(R, tr)
    kern = functools.partial(_ln_qkv_kernel, d_model=D, q_scale=q_scale)
    q, k, v = pl.pallas_call(
        kern,
        out_shape=(jax.ShapeDtypeStruct((Rp, D), x.dtype),) * 3,
        grid=(Rp // tr,),
        in_specs=[
            pl.BlockSpec((tr, D), lambda i: (i, 0)),
            pl.BlockSpec((1, D), lambda i: (0, 0)),
            pl.BlockSpec((1, D), lambda i: (0, 0)),
            pl.BlockSpec((D, 3 * D), lambda i: (0, 0)),
            pl.BlockSpec((1, 3 * D), lambda i: (0, 0)),
        ],
        out_specs=(pl.BlockSpec((tr, D), lambda i: (i, 0)),) * 3,
        compiler_params=_cparams(("parallel",)),
    )(_pad_rows(x, Rp), gamma, beta, w_qkv, b_qkv)
    return q[:R], k[:R], v[:R]


# ----------------------------------------------------------------------------
# Kernel 2: flash-style multi-head attention with in-kernel key mask,
#           fused with the output projection and the residual add:
#               out = x + softmax(Q K^T + mask_bias) V @ W_o + b_o
#           grid = (batch, kv_blocks); online softmax over the kv axis;
#           single lane-dense (S, D) f32 scratches for m / l / acc.
# ----------------------------------------------------------------------------
def _mha_proj_res_kernel(mask_ref, q_ref, k_ref, v_ref, x_ref, wo_ref, bo_ref,
                         o_ref, m_scr, l_scr, acc_scr, *, num_heads):
    kv = pl.program_id(1)

    @pl.when(kv == 0)
    def _():
        m_scr[...] = jnp.full(m_scr.shape, -jnp.inf, dtype=m_scr.dtype)
        l_scr[...] = jnp.zeros(l_scr.shape, dtype=l_scr.dtype)
        acc_scr[...] = jnp.zeros(acc_scr.shape, dtype=acc_scr.dtype)

    # (1, tkv) additive key-mask built in-kernel: 0 = keep, -1e9 = masked out.
    neg_bias = jnp.where(mask_ref[0] > 0, 0.0, -1e9).astype(jnp.float32)

    q = q_ref[0]                       # (S, D) bf16, already scaled by 1/sqrt(hd)
    k = k_ref[0]                       # (tkv, D)
    v = v_ref[0]                       # (tkv, D)
    d_model = q.shape[-1]
    hd = d_model // num_heads

    # TODO(synk): static unroll over heads; use lax.fori_loop + pl.ds for many heads.
    for h in range(num_heads):
        lo, hi = h * hd, (h + 1) * hd
        qh, kh, vh = q[:, lo:hi], k[:, lo:hi], v[:, lo:hi]
        # contract the last dims directly (no explicit k.T relayout)
        s = jax.lax.dot_general(qh, kh, (((1,), (1,)), ((), ())),
                                preferred_element_type=jnp.float32)     # (S, tkv)
        s = s + neg_bias

        m_prev = m_scr[:, lo:hi]                                        # (S, hd), lanes equal
        l_prev = l_scr[:, lo:hi]
        s_max = jnp.max(s, axis=-1, keepdims=True)                      # (S, 1)
        m_new1 = jnp.maximum(m_prev[:, :1], s_max)                      # (S, 1)
        alpha1 = jnp.exp(m_prev[:, :1] - m_new1)                        # (S, 1)
        p = jnp.exp(s - m_new1)                                         # (S, tkv)

        l_scr[:, lo:hi] = alpha1 * l_prev + jnp.sum(p, axis=-1, keepdims=True)
        m_scr[:, lo:hi] = jnp.maximum(m_prev, s_max)
        pv = jnp.dot(p.astype(vh.dtype), vh,
                     preferred_element_type=jnp.float32)                # (S, hd)
        acc_scr[:, lo:hi] = alpha1 * acc_scr[:, lo:hi] + pv

    @pl.when(kv == pl.num_programs(1) - 1)
    def _():
        inv_l = pl.reciprocal(l_scr[...], approx=True)                  # (S, D), lanes equal/head
        attn = (acc_scr[...] * inv_l).astype(wo_ref.dtype)              # (S, D) bf16
        out = jnp.dot(attn, wo_ref[...], preferred_element_type=jnp.float32)
        out = out + bo_ref[...].astype(jnp.float32) + x_ref[0].astype(jnp.float32)
        o_ref[0] = out.astype(o_ref.dtype)                              # single lane-dense store


def flash_mha_proj_residual(q, k, v, x, attention_mask, w_o, b_o,
                            *, num_heads, block_kv=1024):
    B, S, D = q.shape
    assert D % num_heads == 0
    tkv = min(block_kv, S)
    assert S % tkv == 0 and (tkv == S or tkv % 128 == 0), "kv tile must be 128-aligned"
    num_kv = S // tkv
    mask3 = attention_mask.astype(jnp.float32).reshape(B, 1, S)

    kern = functools.partial(_mha_proj_res_kernel, num_heads=num_heads)
    return pl.pallas_call(
        kern,
        out_shape=jax.ShapeDtypeStruct((B, S, D), x.dtype),
        grid=(B, num_kv),
        in_specs=[
            pl.BlockSpec((1, 1, tkv), lambda b, j: (b, 0, j)),
            pl.BlockSpec((1, S, D), lambda b, j: (b, 0, 0)),
            pl.BlockSpec((1, tkv, D), lambda b, j: (b, j, 0)),
            pl.BlockSpec((1, tkv, D), lambda b, j: (b, j, 0)),
            pl.BlockSpec((1, S, D), lambda b, j: (b, 0, 0)),
            pl.BlockSpec((D, D), lambda b, j: (0, 0)),
            pl.BlockSpec((1, D), lambda b, j: (0, 0)),
        ],
        out_specs=pl.BlockSpec((1, S, D), lambda b, j: (b, 0, 0)),
        scratch_shapes=[
            pltpu.VMEM((S, D), jnp.float32),   # running max m  (per-head value in its lane slab)
            pltpu.VMEM((S, D), jnp.float32),   # running sum l
            pltpu.VMEM((S, D), jnp.float32),   # output accumulator
        ],
        compiler_params=_cparams(("parallel", "arbitrary")),
    )(mask3, q, k, v, x, w_o, b_o)


# ----------------------------------------------------------------------------
# Kernel 3: pre-norm LayerNorm fused with the MLP and the residual add,
#           tiled over the d_ff axis:
#               out = x + (gelu(LN(x) @ W1 + b1) @ W2 + b2)
#           grid = (row_blocks, ff_blocks); LN(x) cached in a bf16 scratch,
#           f32 accumulator init/finalized with pl.when.
# ----------------------------------------------------------------------------
def _ln_ffn_add_kernel(x_ref, g_ref, b_ref, w1_ref, b1_ref, w2_ref, b2_ref,
                       o_ref, y_scr, acc_scr):
    f = pl.program_id(1)

    @pl.when(f == 0)
    def _():
        y = _layernorm_f32(x_ref[...].astype(jnp.float32), g_ref, b_ref)
        y_scr[...] = y.astype(y_scr.dtype)
        acc_scr[...] = jnp.zeros(acc_scr.shape, dtype=acc_scr.dtype)

    h = jnp.dot(y_scr[...], w1_ref[...], preferred_element_type=jnp.float32)
    h = jax.nn.gelu(h + b1_ref[...].astype(jnp.float32), approximate=True)
    acc_scr[...] += jnp.dot(h.astype(w2_ref.dtype), w2_ref[...],
                            preferred_element_type=jnp.float32)

    @pl.when(f == pl.num_programs(1) - 1)
    def _():
        o = acc_scr[...] + b2_ref[...].astype(jnp.float32) + x_ref[...].astype(jnp.float32)
        o_ref[...] = o.astype(o_ref.dtype)


def ln_ffn_residual(x, gamma, beta, w1, b1, w2, b2, *, tr=256, tf=1024):
    R, D = x.shape
    F = w1.shape[1]
    tr, Rp = _choose_rows(R, tr)
    tf = _choose_ff_tile(F, tf)
    out = pl.pallas_call(
        _ln_ffn_add_kernel,
        out_shape=jax.ShapeDtypeStruct((Rp, D), x.dtype),
        grid=(Rp // tr, F // tf),
        in_specs=[
            pl.BlockSpec((tr, D), lambda i, f: (i, 0)),
            pl.BlockSpec((1, D), lambda i, f: (0, 0)),
            pl.BlockSpec((1, D), lambda i, f: (0, 0)),
            pl.BlockSpec((D, tf), lambda i, f: (0, f)),
            pl.BlockSpec((1, tf), lambda i, f: (0, f)),
            pl.BlockSpec((tf, D), lambda i, f: (f, 0)),
            pl.BlockSpec((1, D), lambda i, f: (0, 0)),
        ],
        out_specs=pl.BlockSpec((tr, D), lambda i, f: (i, 0)),
        scratch_shapes=[
            pltpu.VMEM((tr, D), jnp.bfloat16),   # cached LN(x)
            pltpu.VMEM((tr, D), jnp.float32),    # d_ff accumulator
        ],
        compiler_params=_cparams(("parallel", "arbitrary")),
    )(_pad_rows(x, Rp), gamma, beta, w1, b1, w2, b2)
    return out[:R]


# ----------------------------------------------------------------------------
# ResidualBlock wrappers (matching ResidualBlock.forward semantics)
# ----------------------------------------------------------------------------
def residual_block_attention(params, x, attention_mask=None, use_cache=True,
                             block_kv=1024):
    """ResidualBlock(pre_norm=LayerNorm, module=SelfAttention):
       out = x + Attn(LN(x)); module's extra tuple outputs (k, v) passed through."""
    B, S, D = x.shape
    H = params["num_heads"]
    hd = D // H
    xf = x.reshape(B * S, D)

    q, k, v = ln_qkv_proj(xf, params["ln1_g"], params["ln1_b"],
                          params["w_qkv"], params["b_qkv"],
                          q_scale=1.0 / float(hd) ** 0.5)
    q = q.reshape(B, S, D)
    k = k.reshape(B, S, D)
    v = v.reshape(B, S, D)

    if attention_mask is None:
        attention_mask = jnp.ones((B, S), jnp.float32)

    out = flash_mha_proj_residual(q, k, v, x, attention_mask,
                                  params["w_o"], params["b_o"],
                                  num_heads=H, block_kv=block_kv)

    # cache layout (B, S, H, head_dim): pure metadata reshape, no transpose round trip.
    cache = None
    if use_cache:
        cache = (k.reshape(B, S, H, hd), v.reshape(B, S, H, hd))
    return out, cache


def residual_block_ffn(params, x, tf=1024):
    """ResidualBlock(pre_norm=LayerNorm, module=MLP): out = x + FFN(LN(x))."""
    B, S, D = x.shape
    out = ln_ffn_residual(x.reshape(B * S, D), params["ln2_g"], params["ln2_b"],
                          params["w1"], params["b1"], params["w2"], params["b2"],
                          tf=tf)
    return out.reshape(B, S, D)


def init_params(key, d_model, num_heads, d_ff, dtype=jnp.bfloat16):
    ks = jax.random.split(key, 4)
    s = 0.02
    return {
        "num_heads": num_heads,
        "ln1_g": jnp.ones((1, d_model), dtype),
        "ln1_b": jnp.zeros((1, d_model), dtype),
        "ln2_g": jnp.ones((1, d_model), dtype),
        "ln2_b": jnp.zeros((1, d_model), dtype),
        "w_qkv": (s * jax.random.normal(ks[0], (d_model, 3 * d_model))).astype(dtype),
        "b_qkv": jnp.zeros((1, 3 * d_model), dtype),
        "w_o": (s * jax.random.normal(ks[1], (d_model, d_model))).astype(dtype),
        "b_o": jnp.zeros((1, d_model), dtype),
        "w1": (s * jax.random.normal(ks[2], (d_model, d_ff))).astype(dtype),
        "b1": jnp.zeros((1, d_ff), dtype),
        "w2": (s * jax.random.normal(ks[3], (d_ff, d_model))).astype(dtype),
        "b2": jnp.zeros((1, d_model), dtype),
    }


# ----------------------------------------------------------------------------
# Pure-JAX f32 reference for a loose numerical sanity check
# ----------------------------------------------------------------------------
def _reference_two_blocks(params, x, mask):
    f32 = jnp.float32
    x = x.astype(f32)
    B, S, D = x.shape
    H = params["num_heads"]
    hd = D // H

    def ln(v, g, b):
        m = v.mean(-1, keepdims=True)
        c = v - m
        var = (c * c).mean(-1, keepdims=True)
        return c * jax.lax.rsqrt(var + EPS) * g.astype(f32) + b.astype(f32)

    y = ln(x, params["ln1_g"], params["ln1_b"])
    qkv = y @ params["w_qkv"].astype(f32) + params["b_qkv"].astype(f32)
    q, k, v = jnp.split(qkv, 3, axis=-1)
    q = q.reshape(B, S, H, hd).transpose(0, 2, 1, 3)
    k = k.reshape(B, S, H, hd).transpose(0, 2, 1, 3)
    v = v.reshape(B, S, H, hd).transpose(0, 2, 1, 3)
    s = (q @ k.transpose(0, 1, 3, 2)) / float(hd) ** 0.5
    s = s + jnp.where(mask[:, None, None, :] > 0, 0.0, -1e9)
    p = jax.nn.softmax(s, axis=-1)
    a = (p @ v).transpose(0, 2, 1, 3).reshape(B, S, D)
    out1 = x + a @ params["w_o"].astype(f32) + params["b_o"].astype(f32)

    y2 = ln(out1, params["ln2_g"], params["ln2_b"])
    h = jax.nn.gelu(y2 @ params["w1"].astype(f32) + params["b1"].astype(f32),
                    approximate=True)
    out2 = out1 + h @ params["w2"].astype(f32) + params["b2"].astype(f32)
    return out2


if __name__ == "__main__":
    B, S, D, H, F = 2, 256, 128, 4, 512

    key = jax.random.PRNGKey(0)
    kx, kp = jax.random.split(key)
    x = jax.random.normal(kx, (B, S, D), jnp.float32).astype(jnp.bfloat16)
    params = init_params(kp, D, H, F)
    attn_mask = jnp.ones((B, S), jnp.float32)   # 1 = keep, 0 = pad

    # block_kv=128 -> 2 KV blocks / batch row and tf=256 -> 2 d_ff blocks:
    # small values only to exercise the online-softmax and ff-accumulator paths
    # at this toy size (production defaults are block_kv=1024, tf=1024).
    out1, cache = residual_block_attention(params, x, attention_mask=attn_mask,
                                           use_cache=True, block_kv=128)
    out2 = residual_block_ffn(params, out1, tf=256)

    jax.block_until_ready(out1)
    jax.block_until_ready(out2)
    jax.block_until_ready(cache)

    assert out1.shape == (B, S, D) and out2.shape == (B, S, D)
    assert cache[0].shape == (B, S, H, D // H) and cache[1].shape == (B, S, H, D // H)
    assert bool(jnp.isfinite(out2.astype(jnp.float32)).all())

    ref = _reference_two_blocks(params, x, attn_mask)
    err = float(jnp.max(jnp.abs(out2.astype(jnp.float32) - ref)))
    assert err < 0.15, f"max abs err vs f32 reference too large: {err}"

    print("KERNEL_OK")
</pallas_src>

<mosaic_0001>
module attributes {stable_mosaic.version = 11 : i64} {
  func.func @_ln_qkv_kernel(%arg0: i32, %arg1: memref<256x128xbf16, #tpu.memory_space<vmem>>, %arg2: memref<1x128xbf16, #tpu.memory_space<vmem>>, %arg3: memref<1x128xbf16, #tpu.memory_space<vmem>>, %arg4: memref<128x384xbf16, #tpu.memory_space<vmem>>, %arg5: memref<1x384xbf16, #tpu.memory_space<vmem>>, %arg6: memref<256x128xbf16, #tpu.memory_space<vmem>>, %arg7: memref<256x128xbf16, #tpu.memory_space<vmem>>, %arg8: memref<256x128xbf16, #tpu.memory_space<vmem>>) attributes {dimension_semantics = [#tpu.dimension_semantics<parallel>], iteration_bounds = array<i64: 2>, scalar_prefetch = 0 : i64, scratch_operands = 0 : i64, tpu.core_type = #tpu.core_type<tc>, window_params = [{transform_indices = @transform_0, window_bounds = array<i64: 256, 128>}, {pipeline_mode = #tpu.pipeline_mode<synchronous>, transform_indices = @transform_1, window_bounds = array<i64: 1, 128>}, {pipeline_mode = #tpu.pipeline_mode<synchronous>, transform_indices = @transform_2, window_bounds = array<i64: 1, 128>}, {pipeline_mode = #tpu.pipeline_mode<synchronous>, transform_indices = @transform_3, window_bounds = array<i64: 128, 384>}, {pipeline_mode = #tpu.pipeline_mode<synchronous>, transform_indices = @transform_4, window_bounds = array<i64: 1, 384>}, {transform_indices = @transform_5, window_bounds = array<i64: 256, 128>}, {transform_indices = @transform_6, window_bounds = array<i64: 256, 128>}, {transform_indices = @transform_7, window_bounds = array<i64: 256, 128>}]} {
    %c0 = arith.constant 0 : index
    %c0_0 = arith.constant 0 : index
    %0 = vector.load %arg1[%c0, %c0_0] : memref<256x128xbf16, #tpu.memory_space<vmem>>, vector<256x128xbf16>
    %1 = arith.extf %0 : vector<256x128xbf16> to vector<256x128xf32>
    %cst = arith.constant dense<0.000000e+00> : vector<256xf32>
    %2 = vector.multi_reduction <add>, %1, %cst [1] : vector<256x128xf32> to vector<256xf32>
    %3 = vector.shape_cast %2 : vector<256xf32> to vector<256x1xf32>
    %cst_1 = arith.constant 1.280000e+02 : f32
    %4 = vector.broadcast %cst_1 : f32 to vector<256x1xf32>
    %5 = arith.divf %3, %4 : vector<256x1xf32>
    %6 = vector.broadcast %5 : vector<256x1xf32> to vector<256x128xf32>
    %7 = arith.subf %1, %6 : vector<256x128xf32>
    %8 = arith.mulf %7, %7 : vector<256x128xf32>
    %cst_2 = arith.constant dense<0.000000e+00> : vector<256xf32>
    %9 = vector.multi_reduction <add>, %8, %cst_2 [1] : vector<256x128xf32> to vector<256xf32>
    %10 = vector.shape_cast %9 : vector<256xf32> to vector<256x1xf32>
    %cst_3 = arith.constant 1.280000e+02 : f32
    %11 = vector.broadcast %cst_3 : f32 to vector<256x1xf32>
    %12 = arith.divf %10, %11 : vector<256x1xf32>
    %cst_4 = arith.constant 9.99999974E-6 : f32
    %13 = vector.broadcast %cst_4 : f32 to vector<256x1xf32>
    %14 = arith.addf %12, %13 : vector<256x1xf32>
    %15 = math.rsqrt %14 : vector<256x1xf32>
    %16 = vector.broadcast %15 : vector<256x1xf32> to vector<256x128xf32>
    %17 = arith.mulf %7, %16 : vector<256x128xf32>
    %c0_5 = arith.constant 0 : index
    %c0_6 = arith.constant 0 : index
    %18 = vector.load %arg2[%c0_5, %c0_6] : memref<1x128xbf16, #tpu.memory_space<vmem>>, vector<1x128xbf16>
    %19 = arith.extf %18 : vector<1x128xbf16> to vector<1x128xf32>
    %20 = vector.broadcast %19 : vector<1x128xf32> to vector<256x128xf32>
    %21 = arith.mulf %17, %20 : vector<256x128xf32>
    %c0_7 = arith.constant 0 : index
    %c0_8 = arith.constant 0 : index
    %22 = vector.load %arg3[%c0_7, %c0_8] : memref<1x128xbf16, #tpu.memory_space<vmem>>, vector<1x128xbf16>
    %23 = arith.extf %22 : vector<1x128xbf16> to vector<1x128xf32>
    %24 = vector.broadcast %23 : vector<1x128xf32> to vector<256x128xf32>
    %25 = arith.addf %21, %24 : vector<256x128xf32>
    %26 = arith.truncf %25 : vector<256x128xf32> to vector<256x128xbf16>
    %c0_9 = arith.constant 0 : index
    %c0_10 = arith.constant 0 : index
    %27 = vector.load %arg4[%c0_9, %c0_10] : memref<128x384xbf16, #tpu.memory_space<vmem>>, vector<128x384xbf16>
    %cst_11 = arith.constant dense<0.000000e+00> : vector<256x384xf32>
    %28 = tpu.matmul %26, %27, %cst_11 {dimension_numbers = #tpu.dot_dimension_numbers<[1], [0], [0], [1], [0, 0, 1, 1], [], []>} : vector<256x128xbf16>, vector<128x384xbf16>, vector<256x384xf32> -> vector<256x384xf32>
    %c0_12 = arith.constant 0 : index
    %c0_13 = arith.constant 0 : index
    %29 = vector.load %arg5[%c0_12, %c0_13] : memref<1x384xbf16, #tpu.memory_space<vmem>>, vector<1x384xbf16>
    %30 = arith.extf %29 : vector<1x384xbf16> to vector<1x384xf32>
    %31 = vector.broadcast %30 : vector<1x384xf32> to vector<256x384xf32>
    %32 = arith.addf %28, %31 : vector<256x384xf32>
    %33 = vector.extract_strided_slice %32 {offsets = [0, 0], sizes = [256, 128], strides = [1, 1]} : vector<256x384xf32> to vector<256x128xf32>
    %cst_14 = arith.constant 0.176776692 : f32
    %34 = vector.broadcast %cst_14 : f32 to vector<256x128xf32>
    %35 = arith.mulf %33, %34 : vector<256x128xf32>
    %36 = arith.truncf %35 : vector<256x128xf32> to vector<256x128xbf16>
    %c0_15 = arith.constant 0 : index
    %c0_16 = arith.constant 0 : index
    %37 = vector.load %arg6[%c0_15, %c0_16] : memref<256x128xbf16, #tpu.memory_space<vmem>>, vector<256x128xbf16>
    tpu.vector_store %arg6[%c0_15, %c0_16], %36 {strides = array<i32>} : memref<256x128xbf16, #tpu.memory_space<vmem>>, vector<256x128xbf16>,
    %38 = vector.extract_strided_slice %32 {offsets = [0, 128], sizes = [256, 128], strides = [1, 1]} : vector<256x384xf32> to vector<256x128xf32>
    %39 = arith.truncf %38 : vector<256x128xf32> to vector<256x128xbf16>
    %c0_17 = arith.constant 0 : index
    %c0_18 = arith.constant 0 : index
    %40 = vector.load %arg7[%c0_17, %c0_18] : memref<256x128xbf16, #tpu.memory_space<vmem>>, vector<256x128xbf16>
    tpu.vector_store %arg7[%c0_17, %c0_18], %39 {strides = array<i32>} : memref<256x128xbf16, #tpu.memory_space<vmem>>, vector<256x128xbf16>,
    %41 = vector.extract_strided_slice %32 {offsets = [0, 256], sizes = [256, 128], strides = [1, 1]} : vector<256x384xf32> to vector<256x128xf32>
    %42 = arith.truncf %41 : vector<256x128xf32> to vector<256x128xbf16>
    %c0_19 = arith.constant 0 : index
    %c0_20 = arith.constant 0 : index
    %43 = vector.load %arg8[%c0_19, %c0_20] : memref<256x128xbf16, #tpu.memory_space<vmem>>, vector<256x128xbf16>
    tpu.vector_store %arg8[%c0_19, %c0_20], %42 {strides = array<i32>} : memref<256x128xbf16, #tpu.memory_space<vmem>>, vector<256x128xbf16>,
    return
  }
  func.func @transform_0(%arg0: i32) -> (i32, i32) {
    %c0_i32 = arith.constant 0 : i32
    %c0_i32_0 = arith.constant 0 : i32
    return %arg0, %c0_i32 : i32, i32
  }
  func.func @transform_1(%arg0: i32) -> (i32, i32) {
    %c0_i32 = arith.constant 0 : i32
    %c0_i32_0 = arith.constant 0 : i32
    %c0_i32_1 = arith.constant 0 : i32
    return %c0_i32, %c0_i32_0 : i32, i32
  }
  func.func @transform_2(%arg0: i32) -> (i32, i32) {
    %c0_i32 = arith.constant 0 : i32
    %c0_i32_0 = arith.constant 0 : i32
    %c0_i32_1 = arith.constant 0 : i32
    return %c0_i32, %c0_i32_0 : i32, i32
  }
  func.func @transform_3(%arg0: i32) -> (i32, i32) {
    %c0_i32 = arith.constant 0 : i32
    %c0_i32_0 = arith.constant 0 : i32
    %c0_i32_1 = arith.constant 0 : i32
    return %c0_i32, %c0_i32_0 : i32, i32
  }
  func.func @transform_4(%arg0: i32) -> (i32, i32) {
    %c0_i32 = arith.constant 0 : i32
    %c0_i32_0 = arith.constant 0 : i32
    %c0_i32_1 = arith.constant 0 : i32
    return %c0_i32, %c0_i32_0 : i32, i32
  }
  func.func @transform_5(%arg0: i32) -> (i32, i32) {
    %c0_i32 = arith.constant 0 : i32
    %c0_i32_0 = arith.constant 0 : i32
    return %arg0, %c0_i32 : i32, i32
  }
  func.func @transform_6(%arg0: i32) -> (i32, i32) {
    %c0_i32 = arith.constant 0 : i32
    %c0_i32_0 = arith.constant 0 : i32
    return %arg0, %c0_i32 : i32, i32
  }
  func.func @transform_7(%arg0: i32) -> (i32, i32) {
    %c0_i32 = arith.constant 0 : i32
    %c0_i32_0 = arith.constant 0 : i32
    return %arg0, %c0_i32 : i32, i32
  }
}

</mosaic_0001>

<bundles_post_ra>
// kernel: tpu_custom_call.1
= control target key start
LH: loop header
LB: loop body
LE: loop exit
PB: predicated region body
PF: predicated region fallthrough
CT: control target
= control target key end

     0   :  { %s4431_s0 = inlined_call_operand.hbm [shape: bf16[512,128], index: 0, kind: input, shape index: {}]   ;;  %s4432_s1 = inlined_call_operand.hbm [shape: bf16[1,128], index: 1, kind: input, shape index: {}]   ;;  %s4433_s2 = inlined_call_operand.hbm [shape: bf16[1,128], index: 2, kind: input, shape index: {}]   ;;  %s4434_s3 = inlined_call_operand.hbm [shape: bf16[128,384], index: 3, kind: input, shape index: {}]   ;;  %s4435_s4 = inlined_call_operand.hbm [shape: bf16[1,384], index: 4, kind: input, shape index: {}]   ;;  %s4436_s5 = inlined_call_operand.hbm [shape: bf16[512,128], index: 5, kind: output, shape index: {0}]   ;;  %s4437_s6 = inlined_call_operand.hbm [shape: bf16[512,128], index: 6, kind: output, shape index: {1}]   ;;  %s4438_s7 = inlined_call_operand.hbm [shape: bf16[512,128], index: 7, kind: output, shape index: {2}]  }
   0x1   :  { %4443 = sst [smem:[#allocation20_spill]] %s4431_s0 }
   0x2   :  { %4444 = sst [smem:[#allocation21_spill]] %s4432_s1 }
   0x3   :  { %4445 = sst [smem:[#allocation22_spill]] %s4433_s2 }
   0x4   :  { %13 = vsyncpa [#allocation3], 0 }
   0x5   :  { %15 = vsyncpa [#allocation3 + $0x1], 0 }
   0x6   :  { %16 = vsyncpa [#allocation6], 0 }
   0x7   :  { %17 = vsyncpa [#allocation9], 0 }
   0x8   :  { %18 = vsyncpa [#allocation4], 0 }
   0x9   :  { %20 = vsyncpa [#allocation4 + $0x1], 0 }
   0xa   :  { %21 = vsyncpa [#allocation13], 0 }
   0xb   :  { %23 = vsyncpa [#allocation13 + $0x1], 0  ;;  %s3400_s24 = smov 0   ;;  %s3402_s25 = smov 0  }
   0xc   :  { %s3404_s26 = smov 0   ;;  %s3406_s27 = smov 0  }
   0xd LB: > { %s3421_s28 = sadd.s32 4294967295, %s3343_s27   ;;  %s4442_s29 = sadd.s32 4294967294, %s3343_s27   ;;  %s3343_s27 = sphi %s3406_s27, %s4470_s27   ;;  %s3339_s26 = sphi %s3404_s26, %s4469_s26   ;;  %s3335_s25 = sphi %s3402_s25, %s4468_s25   ;;  %s3331_s24 = sphi %s3400_s24, %s4467_s24  }
   0xe   : > { %p49_p0 = scmp.ne.s32.totalorder %s3335_s25, %s3331_s24  ;;  %p4439_p1 = scmp.eq.s32.totalorder %s3421_s28, 0 }
   0xf   : > { %p163_p3 = scmp.eq.s32.totalorder %s4442_s29, 1  ;;  %p2166_p5 = scmp.ge.s32.totalorder %s3343_s27, 1 }
  0x10   : > { %p3432_p4 = por %p4439_p1, %p49_p0  ;;  %p222_p7 = scmp.lt.s32.totalorder %s3343_s27, 3 }
  0x11   : > { %p3437_p6 = por %p163_p3, %p49_p0  ;;  %s3345_s10 = smov [#allocation5]  }
  0x12   : > { %s4446_s30 = scalar_select %p3432_p4, 1, 0 }
  0x13   : > { %s4447_s8 = scalar_select %p3437_p6, 1, 0 }
  0x14   : > { %p3442_p8 = pnand %p2166_p5, %p222_p7  ;;  %s235_s11 = sshll.u32 %s3345_s10, 4  ;;  %s236_s11 = int_to_ptr.vmem [resolvable:$true] %s235_s11 }
  0x15   : > { %s3346_s12 = smov [#allocation8]   ;;  %s3347_s15 = smov [#allocation7]  }
  0x16   : > { %s4448_s9 = scalar_select %p3442_p8, 1, 0 }
  0x17   : > { %p2891_p10 = pneg %p3442_p8  ;;  %s256_s13 = sshll.u32 %s3346_s12, 4  ;;  %s3455_s13 = int_to_ptr.vmem [resolvable:$true] %s256_s13 }
  0x18   : > { %s3457_s16 = sshll.u32 %s3347_s15, 4  ;;  %s4450_s1 = sld [smem:[#allocation21_spill]]  ;;  %s247_s16 = int_to_ptr.vmem [resolvable:$true] %s3457_s16 }
  0x19   : > { %p3451_p11 = pnand %p2891_p10, %p4439_p1 }
  0x1b   : > { %p3467_p13 = pneg %p3451_p11 }
  0x1e   : > { %s3067_s19 = scalar_lea.hbm %s4450_s1, 16 }
  0x1f   : > { %p3068_p12 = scmp.ne.s32.totalorder %s4450_s1, %s3067_s19  ;;  %p3074_p5 = scmp.lt.u32.totalorder %s3067_s19, %s4450_s1 }
  0x21   : > { %p3070_p0 = pnand %p3467_p13, %p3068_p12 }
  0x23   : > { %p3071_p3 = pneg %p3070_p0 }
  0x25   : > { %p3076_p7 = pnand %p3074_p5, %p3071_p3 }
  0x27   : > { %3079 = shalt.err (!%p3076_p7)
}
  0x28   : > { %s3080_s12 = scalar_lea.vmem %s236_s11, 16  ;;  %s3087_s15 = scalar_lea.vmem %s236_s11, 32 }
  0x29   : > { %p3081_p10 = scmp.ne.s32.totalorder %s236_s11, %s3080_s12  ;;  %p3088_p2 = scmp.lt.s32.totalorder %s236_s11, %s236_s11 }
  0x2a   : > { %p3089_p6 = scmp.lt.s32.totalorder %s3087_s15, %s3080_s12 }
  0x2b   : > { %p3083_p9 = pnand %p3081_p10, %p3467_p13 }
  0x2c   : > { %p3090_p4 = por %p3089_p6, %p3088_p2 }
  0x2d   : > { %p3084_p1 = pneg %p3083_p9 }
  0x2f   : > { %p3091_p8 = pnand %p3090_p4, %p3084_p1 }
  0x31   : > { %3094 = shalt.err (!%p3091_p8)
}
  0x32   : > { %2894 = dma.hbm_to_vmem [thread:$0]  (!%p3451_p11), %s4450_s1, 16, %s236_s11, [#allocation6]  }
  0x33   : > { %s3095_s21 = scalar_lea.hbm %s4434_s3, 3072 }
  0x34   : > { %p3096_p9 = scmp.ne.s32.totalorder %s4434_s3, %s3095_s21  ;;  %p3102_p1 = scmp.lt.u32.totalorder %s3095_s21, %s4434_s3 }
  0x36   : > { %p3098_p12 = pnand %p3096_p9, %p3467_p13 }
  0x38   : > { %p3099_p2 = pneg %p3098_p12 }
  0x3a   : > { %p3104_p4 = pnand %p3102_p1, %p3099_p2 }
  0x3c   : > { %3107 = shalt.err (!%p3104_p4)
}
  0x3d   : > { %s3108_s11 = scalar_lea.vmem %s3455_s13, 3072  ;;  %p3116_p3 = scmp.lt.s32.totalorder %s3455_s13, %s3455_s13 }
  0x3e   : > { %p3109_p6 = scmp.ne.s32.totalorder %s3455_s13, %s3108_s11  ;;  %p3117_p5 = scmp.lt.s32.totalorder %s3108_s11, %s3108_s11 }
  0x40   : > { %p3111_p8 = pnand %p3109_p6, %p3467_p13  ;;  %p3118_p7 = por %p3117_p5, %p3116_p3 }
  0x42   : > { %p3112_p0 = pneg %p3111_p8 }
  0x44   : > { %p3119_p10 = pnand %p3118_p7, %p3112_p0 }
  0x46   : > { %3122 = shalt.err (!%p3119_p10)
}
  0x47   : > { %s3348_s17 = smov 192   ;;  %s3349_s18 = smov 12  }
  0x48   : > { %2900 = dma.hbm_to_vmem [thread:$0]  (!%p3451_p11), %s4434_s3, 3072, %s3455_s13, [#allocation9], %s3348_s17, %s3348_s17, %s3349_s18  }
  0x49   : > { %s4452_s2 = sld [smem:[#allocation22_spill]] }
  0x4f   : > { %s3123_s10 = scalar_lea.hbm %s4452_s2, 16 }
  0x50   : > { %p3124_p9 = scmp.ne.s32.totalorder %s4452_s2, %s3123_s10  ;;  %p3130_p1 = scmp.lt.u32.totalorder %s3123_s10, %s4452_s2 }
  0x52   : > { %p3126_p12 = pnand %p3124_p9, %p3467_p13 }
  0x54   : > { %p3127_p2 = pneg %p3126_p12 }
  0x56   : > { %p3132_p4 = pnand %p3130_p1, %p3127_p2 }
  0x58   : > { %3135 = shalt.err (!%p3132_p4)
}
  0x59   : > { %s3136_s19 = scalar_lea.vmem %s247_s16, 16  ;;  %s3143_s13 = scalar_lea.vmem %s247_s16, 32 }
  0x5a   : > { %p3137_p6 = scmp.ne.s32.totalorder %s247_s16, %s3136_s19  ;;  %p3144_p3 = scmp.lt.s32.totalorder %s247_s16, %s247_s16 }
  0x5b   : > { %p3145_p5 = scmp.lt.s32.totalorder %s3143_s13, %s3136_s19 }
  0x5c   : > { %p3139_p8 = pnand %p3137_p6, %p3467_p13 }
  0x5d   : > { %p3146_p7 = por %p3145_p5, %p3144_p3 }
  0x5e   : > { %p3140_p0 = pneg %p3139_p8 }
  0x60   : > { %p3147_p10 = pnand %p3146_p7, %p3140_p0 }
  0x62   : > { %3150 = shalt.err (!%p3147_p10)
}
  0x63   : > { %2897 = dma.hbm_to_vmem [thread:$0]  (!%p3451_p11), %s4452_s2, 16, %s247_s16, [#allocation6]  }
  0x64   : > { %s3350_s29 = smov [#allocation10]   ;;  %s3151_s10 = scalar_lea.hbm %s4435_s4, 48 }
  0x65   : > { %s270_s20 = sshll.u32 %s3350_s29, 4  ;;  %p3152_p9 = scmp.ne.s32.totalorder %s4435_s4, %s3151_s10  ;;  %s271_s20 = int_to_ptr.vmem [resolvable:$true] %s270_s20 }
  0x66   : > { %p3158_p1 = scmp.lt.u32.totalorder %s3151_s10, %s4435_s4 }
  0x67   : > { %p3154_p12 = pnand %p3152_p9, %p3467_p13 }
  0x69   : > { %p3155_p2 = pneg %p3154_p12 }
  0x6b   : > { %p3160_p4 = pnand %p3158_p1, %p3155_p2 }
  0x6d   : > { %3163 = shalt.err (!%p3160_p4)
}
  0x6e   : > { %s3164_s16 = scalar_lea.vmem %s271_s20, 48  ;;  %s3171_s13 = scalar_lea.vmem %s271_s20, 64 }
  0x6f   : > { %p3165_p6 = scmp.ne.s32.totalorder %s271_s20, %s3164_s16  ;;  %p3172_p3 = scmp.lt.s32.totalorder %s271_s20, %s271_s20 }
  0x70   : > { %p3173_p5 = scmp.lt.s32.totalorder %s3171_s13, %s3164_s16 }
  0x71   : > { %p3167_p8 = pnand %p3165_p6, %p3467_p13 }
  0x72   : > { %p3174_p7 = por %p3173_p5, %p3172_p3 }
  0x73   : > { %p3168_p0 = pneg %p3167_p8 }
  0x75   : > { %p3175_p10 = pnand %p3174_p7, %p3168_p0 }
  0x77   : > { %3178 = shalt.err (!%p3175_p10)
}
  0x78   : > { %2903 = dma.hbm_to_vmem [thread:$0]  (!%p3451_p11), %s4435_s4, 48, %s271_s20, [#allocation9]  }
  0x79   : > { %s3544_s22 = sadd.s32 1, %s3343_s27   ;;  %s36_s29 = sadd.s32 1, %s3339_s26 }
  0x7a   : > { %s33_s14 = ssub.s32 %s3343_s27, %s3544_s22  ;;  %p43_p13 = scmp.ne.s32.totalorder %s3339_s26, %s3335_s25 }
  0x7b   : > { %p34_p9 = scmp.eq.s32.totalorder %s33_s14, 0  ;;  %p44_p12 = scmp.eq.s32.totalorder %s3343_s27, 0 }
  0x7c   : > { %p4453_p2 = scmp.eq.s32.totalorder %s3421_s28, 1  ;;  %p2922_p4 = scmp.lt.s32.totalorder %s3343_s27, 2 }
  0x7d   : > { %s3560_s23 = scalar_select %p34_p9, %s3339_s26, %s36_s29  }
  0x7e   : > { %p3554_p1 = por %p4453_p2, %p43_p13  ;;  %p45_p6 = por %p44_p12, %p43_p13 }
  0x7f   : > { %s281_s10 = sand.u32 1, %s3339_s26   ;;  %s2315_s20 = sshll.u32 %s3343_s27, 11 }
  0x80   : > { %s2172_s12 = sshll.u32 %s281_s10, 7  ;;  %s4455_s0 = sld [smem:[#allocation20_spill]] }
  0x81   : > { %s285_s16 = scalar_lea.vmem [#allocation2], %s2172_s12  ;;  %p3571_p11 = pnand %p2922_p4, %p45_p6 }
  0x82   : > { %s292_s13 = sshll.u32 %s285_s16, 4  ;;  %s3575_s18 = scalar_lea.sflag [#allocation3], %s281_s10  ;;  %s3569_s13 = int_to_ptr.vmem [resolvable:$true] %s292_s13 }
  0x83   : > { %p3181_p0 = pneg %p3571_p11 }
  0x86   : > { %s3567_s19 = scalar_lea.hbm %s4455_s0, %s2315_s20  ;;  %s3184_s20 = scalar_lea.hbm %s4455_s0, 4096 }
  0x87   : > { %s3179_s29 = scalar_lea.hbm %s3567_s19, 2048  ;;  %p3185_p7 = scmp.lt.u32.totalorder %s3567_s19, %s4455_s0 }
  0x88   : > { %p3180_p8 = scmp.ne.s32.totalorder %s3567_s19, %s3179_s29  ;;  %p3186_p10 = scmp.lt.u32.totalorder %s3184_s20, %s3179_s29 }
  0x89   : > { %p3188_p9 = scmp.lt.u32.totalorder %s3179_s29, %s3567_s19 }
  0x8a   : > { %p3182_p3 = pnand %p3181_p0, %p3180_p8  ;;  %p3187_p13 = por %p3186_p10, %p3185_p7 }
  0x8c   : > { %p3183_p5 = pneg %p3182_p3  ;;  %p3189_p12 = por %p3188_p9, %p3187_p13 }
  0x8e   : > { %p3190_p2 = pnand %p3189_p12, %p3183_p5 }
  0x90   : > { %3193 = shalt.err (!%p3190_p2)
}
  0x91   : > { %s3194_s10 = scalar_lea.vmem %s3569_s13, 2048  ;;  %s3351_s16 = smov [#allocation2]  }
  0x92   : > { %p3195_p4 = scmp.ne.s32.totalorder %s3569_s13, %s3194_s10  ;;  %s3199_s14 = sshll.u32 %s3351_s16, 4  ;;  %s3200_s14 = int_to_ptr.vmem [resolvable:$false] %s3199_s14 }
  0x93   : > { %s3201_s12 = scalar_lea.vmem %s3200_s14, 4096  ;;  %p3202_p3 = scmp.lt.s32.totalorder %s3569_s13, %s3200_s14 }
  0x94   : > { %p3197_p6 = pnand %p3195_p4, %p3181_p0  ;;  %p3203_p7 = scmp.lt.s32.totalorder %s3201_s12, %s3194_s10 }
  0x96   : > { %p3198_p8 = pneg %p3197_p6  ;;  %p3204_p10 = por %p3203_p7, %p3202_p3 }
  0x98   : > { %p3205_p13 = pnand %p3204_p10, %p3198_p8 }
  0x9a   : > { %3208 = shalt.err (!%p3205_p13)
}
  0x9b   : > { %s3352_s29 = smov 64   ;;  %s3353_s20 = smov 4  }
  0x9c   : > { %2907 = dma.hbm_to_vmem [thread:$0]  (!%p3571_p11), %s3567_s19, 2048, %s3569_s13, %s3575_s18, %s3352_s29, %s3352_s29, %s3353_s20  }
  0x9d   : > { %p4457_p0 = scmp.ne.s32.totalorder %s4448_s9, 0 }
  0x9e   : > { %s3606_s15 = sand.u32 (!%p4457_p0), 1, %s3335_s25   ;;  %p4458_p5 = scmp.ne.s32.totalorder (!%p4457_p0), %s4446_s30, 0 }
  0x9f   : > { %304 = sbr.rel (%p4457_p0) target bundleno = 869 (0x365), region = 40  ;;  %s3609_s11 = sshll.u32 (!%p4457_p0), %s3606_s15, 7 }
  0xa0   : > { %s307_s10 = scalar_lea.sflag (!%p4457_p0), [#allocation3], %s3606_s15  ;;  %s3613_s16 = scalar_lea.vmem (!%p4457_p0), [#allocation2], %s3609_s11 }
  0xa6   : > { %3310 = dma.done.wait (%p4458_p5), %s307_s10, 2048  }
  0xa7   : > { %3312 = vsyncadd (%p4458_p5), %s307_s10, 4294965248  ;;  %p4459_p11 = scmp.eq.s32.totalorder %s3421_s28, 0 }
  0xa9   : > { %3314 = dma.done.wait (%p4459_p11), [#allocation6], 32   ;;  %p4460_p9 = pmov %p4459_p11 }
  0xab   : > { %3316 = vsyncadd (%p4460_p9), [#allocation6], 4294967264  ;;  %p4461_p12 = pmov %p4460_p9 }
  0xac   : > { %p4462_p2 = pmov %p4460_p9 }
  0xad   : > { %3318 = dma.done.wait (%p4461_p12), [#allocation9], 3120  }
  0xae   : > { %3320 = vsyncadd (%p4462_p2), [#allocation9], 4294964176  ;;  %v3628_v0 = vld [vmem:[%s3613_s16] sm:$0xff]   ;;  %v3642_v6 = vld [vmem:[%s3613_s16 + $0x8] sm:$0xff]   ;;  %s4141_s30 = scalar_lea.vmem [#allocation12], %s3609_s11  ;;  %s4147_s9 = scalar_lea.vmem [#allocation11], %s3609_s11 }
  0xaf   : > { %v3631_v1 = vld [vmem:[%s3613_s16 + $0x60] sm:$0xff]   ;;  %v2417_v2 = vunpack.c.l.bf16 %v3628_v0  ;;  %v2418_v4 = vunpack.c.h.bf16 %v3628_v0  ;;  %v3645_v7 = vld [vmem:[%s3613_s16 + $0x68] sm:$0xff]   ;;  %v2421_v8 = vunpack.c.l.bf16 %v3642_v6  ;;  %v2422_v9 = vunpack.c.h.bf16 %v3642_v6  ;;  %v3654_v10 = vld [vmem:[%s3613_s16 + $0x10] sm:$0xff]   ;;  %s4205_s19 = scalar_lea.vmem [#allocation14], %s3609_s11  ;;  %s2412_s17 = sshll.u32 %s3421_s28, 11 }
  0xb0   : > { %v2465_v3 = vunpack.c.l.bf16 %v3631_v1  ;;  %v2466_v5 = vunpack.c.h.bf16 %v3631_v1  ;;  %v2469_v11 = vunpack.c.l.bf16 %v3645_v7  ;;  %v2470_v12 = vunpack.c.h.bf16 %v3645_v7  ;;  %v3669_v15 = vld [vmem:[%s3613_s16 + $0x70] sm:$0xff]   ;;  %v3678_v18 = vld [vmem:[%s3613_s16 + $0x18] sm:$0xff]   ;;  %v3696_v24 = vld [vmem:[%s3613_s16 + $0x20] sm:$0xff]   ;;  %s1977_s18 = sshll.u32 %s4141_s30, 4  ;;  %s1961_s14 = sshll.u32 %s4147_s9, 4  ;;  %s4300_s18 = int_to_ptr.vmem [resolvable:$true] %s1977_s18  ;;  %s4310_s14 = int_to_ptr.vmem [resolvable:$true] %s1961_s14 }
  0xb1   : > { %436 = vadd.xlane.f32.xlu0 %v2417_v2  ;;  %v2425_v13 = vunpack.c.l.bf16 %v3654_v10  ;;  %v2426_v14 = vunpack.c.h.bf16 %v3654_v10  ;;  %v2473_v16 = vunpack.c.l.bf16 %v3669_v15  ;;  %v2474_v17 = vunpack.c.h.bf16 %v3669_v15  ;;  %v3687_v21 = vld [vmem:[%s3613_s16 + $0x78] sm:$0xff]   ;;  %v3705_v27 = vld [vmem:[%s3613_s16 + $0x28] sm:$0xff]   ;;  %v3714_v30 = vld [vmem:[%s3613_s16 + $0x30] sm:$0xff]   ;;  %s4294_s20 = scalar_lea.hbm %s4437_s6, %s2412_s17  ;;  %s1993_s11 = sshll.u32 %s4205_s19, 4  ;;  %s4321_s11 = int_to_ptr.vmem [resolvable:$true] %s1993_s11 }
  0xb2   : > { %484 = vadd.xlane.f32.xlu1 %v2465_v3  ;;  %v2429_v19 = vunpack.c.l.bf16 %v3678_v18  ;;  %v2430_v20 = vunpack.c.h.bf16 %v3678_v18  ;;  %v2477_v22 = vunpack.c.l.bf16 %v3687_v21  ;;  %v2478_v23 = vunpack.c.h.bf16 %v3687_v21  ;;  %v3723_v33 = vld [vmem:[%s3613_s16 + $0x38] sm:$0xff]   ;;  %v3732_v36 = vld [vmem:[%s3613_s16 + $0x40] sm:$0xff]   ;;  %v3741_v39 = vld [vmem:[%s3613_s16 + $0x48] sm:$0xff]   ;;  %s4308_s12 = scalar_lea.hbm %s4436_s5, %s2412_s17  ;;  %s4319_s0 = scalar_lea.hbm %s4438_s7, %s2412_s17 }
  0xb3   : > { %v2433_v25 = vunpack.c.l.bf16 %v3696_v24  ;;  %v2434_v26 = vunpack.c.h.bf16 %v3696_v24  ;;  %v2437_v28 = vunpack.c.l.bf16 %v3705_v27  ;;  %v2438_v29 = vunpack.c.h.bf16 %v3705_v27  ;;  %v3750_v42 = vld [vmem:[%s3613_s16 + $0x50] sm:$0xff]   ;;  %v3759_v45 = vld [vmem:[%s3613_s16 + $0x58] sm:$0xff]   ;;  %v2974_v50 = vld [vmem:[#allocation8 + $0x1c] ss:$12 sps:$4 sm:$0xff]   ;;  %s4463_s10 = sand.u32 1, %s3421_s28   ;;  %s3209_s1 = scalar_lea.vmem %s4300_s18, 2048 }
  0xb4   : > { %v2441_v31 = vunpack.c.l.bf16 %v3714_v30  ;;  %v2442_v32 = vunpack.c.h.bf16 %v3714_v30  ;;  %v2445_v34 = vunpack.c.l.bf16 %v3723_v33  ;;  %v2446_v35 = vunpack.c.h.bf16 %v3723_v33  ;;  %v2971_v48 = vld [vmem:[#allocation8 + $0x4] ss:$12 sps:$4 sm:$0xff]   ;;  %v2973_v49 = vld [vmem:[#allocation8] ss:$12 sps:$4 sm:$0xff]   ;;  %s4328_s16 = scalar_lea.sflag [#allocation13], %s4463_s10  ;;  %p3210_p4 = scmp.ne.s32.totalorder %s4300_s18, %s3209_s1 }
  0xb5   : > { %438 = vadd.xlane.f32.xlu0 %v2418_v4  ;;  %v2449_v37 = vunpack.c.l.bf16 %v3732_v36  ;;  %v2450_v38 = vunpack.c.h.bf16 %v3732_v36  ;;  %v2453_v40 = vunpack.c.l.bf16 %v3741_v39  ;;  %v2454_v41 = vunpack.c.h.bf16 %v3741_v39  ;;  %1071 = vmatprep.subr.bf16.mxu0 %v2971_v48 }
  0xb6   : > { %486 = vadd.xlane.f32.xlu1 %v2466_v5  ;;  %v2457_v43 = vunpack.c.l.bf16 %v3750_v42  ;;  %v2458_v44 = vunpack.c.h.bf16 %v3750_v42  ;;  %v2461_v46 = vunpack.c.l.bf16 %v3759_v45  ;;  %v2462_v47 = vunpack.c.h.bf16 %v3759_v45  ;;  %2851 = vmatprep.subr.bf16.mxu1 %v2971_v48  ;;  %p3211_p6 = pnand %p3210_p4, %p3554_p1 }
  0xb7   : > { %1072 = vmatpush1.bf16.msra.mxu0 %v2973_v49  ;;  %2859 = vmatpush1.bf16.msra.mxu1 %v2973_v49  ;;  %v791_v45 = vlaneseq }
  0xb8   : > { %1073 = vmatprep.subr.bf16.mxu0 %v2974_v50  ;;  %2852 = vmatprep.subr.bf16.mxu1 %v2974_v50  ;;  %p3212_p8 = pneg %p3211_p6 }
  0xb9   : > { %440 = vadd.xlane.f32.xlu0 %v2421_v8 }
  0xba   : > { %442 = vadd.xlane.f32.xlu1 %v2422_v9 }
  0xbd   : > { %488 = vadd.xlane.f32.xlu0 %v2469_v11 }
  0xbe   : > { %490 = vadd.xlane.f32.xlu1 %v2470_v12 }
  0xc1   : > { %444 = vadd.xlane.f32.xlu0 %v2425_v13 }
  0xc2   : > { %446 = vadd.xlane.f32.xlu1 %v2426_v14 }
  0xc5   : > { %492 = vadd.xlane.f32.xlu0 %v2473_v16 }
  0xc6   : > { %494 = vadd.xlane.f32.xlu1 %v2474_v17 }
  0xc9   : > { %448 = vadd.xlane.f32.xlu0 %v2429_v19 }
  0xca   : > { %450 = vadd.xlane.f32.xlu1 %v2430_v20 }
  0xcd   : > { %496 = vadd.xlane.f32.xlu0 %v2477_v22 }
  0xce   : > { %498 = vadd.xlane.f32.xlu1 %v2478_v23 }
  0xd1   : > { %452 = vadd.xlane.f32.xlu0 %v2433_v25 }
  0xd2   : > { %454 = vadd.xlane.f32.xlu1 %v2434_v26 }
  0xd5   : > { %456 = vadd.xlane.f32.xlu0 %v2437_v28 }
  0xd6   : > { %458 = vadd.xlane.f32.xlu1 %v2438_v29 }
  0xd9   : > { %460 = vadd.xlane.f32.xlu0 %v2441_v31 }
  0xda   : > { %462 = vadd.xlane.f32.xlu1 %v2442_v32 }
  0xdd   : > { %464 = vadd.xlane.f32.xlu0 %v2445_v34 }
  0xde   : > { %466 = vadd.xlane.f32.xlu1 %v2446_v35 }
  0xe1   : > { %468 = vadd.xlane.f32.xlu0 %v2449_v37 }
  0xe2   : > { %470 = vadd.xlane.f32.xlu1 %v2450_v38 }
  0xe5   : > { %472 = vadd.xlane.f32.xlu0 %v2453_v40 }
  0xe6   : > { %474 = vadd.xlane.f32.xlu1 %v2454_v41 }
  0xe9   : > { %476 = vadd.xlane.f32.xlu0 %v2457_v43 }
  0xea   : > { %478 = vadd.xlane.f32.xlu1 %v2458_v44 }
  0xed   : > { %480 = vadd.xlane.f32.xlu0 %v2461_v46 }
  0xee   : > { %482 = vadd.xlane.f32.xlu1 %v2462_v47 }
 0x13e   : > { %v437_v51 = vpop.xlane.xlu0 %436 }
 0x13f   : > { %v485_v52 = vpop.xlane.xlu1 %484  ;;  %v501_v53 = vmul.f32 0.0078125, %v437_v51 }
 0x140   : > { %v525_v54 = vmul.f32 0.0078125, %v485_v52 }
 0x141   : > { %v3773_v55 = vsub.f32 %v2417_v2, %v501_v53 }
 0x142   : > { %v3777_v56 = vsub.f32 %v2465_v3, %v525_v54  ;;  %v439_v57 = vpop.xlane.xlu0 %438 }
 0x143   : > { %v487_v58 = vpop.xlane.xlu1 %486  ;;  %v502_v59 = vmul.f32 0.0078125, %v439_v57  ;;  %v565_v60 = vmul.f32 %v3773_v55, %v3773_v55 }
 0x144   : > { %v526_v61 = vmul.f32 0.0078125, %v487_v58  ;;  %v589_v2 = vmul.f32 %v3777_v56, %v3777_v56 }
 0x145   : > { %v3783_v62 = vsub.f32 %v2418_v4, %v502_v59  ;;  %597 = vadd.xlane.f32.xlu0 %v565_v60 }
 0x146   : > { %v3787_v63 = vsub.f32 %v2466_v5, %v526_v61  ;;  %v441_v3 = vpop.xlane.xlu0 %440 }
 0x147   : > { %v443_v48 = vpop.xlane.xlu1 %442  ;;  %v503_v49 = vmul.f32 0.0078125, %v441_v3  ;;  %v566_v50 = vmul.f32 %v3783_v62, %v3783_v62  ;;  %v2976_v3 = vld [vmem:[#allocation8 + $0x18] ss:$12 sps:$4 sm:$0xff]  }
 0x148   : > { %v504_v51 = vmul.f32 0.0078125, %v443_v48  ;;  %v590_v4 = vmul.f32 %v3787_v63, %v3787_v63  ;;  %1074 = vmatpush1.bf16.msra.mxu0 %v2976_v3  ;;  %2860 = vmatpush1.bf16.msra.mxu1 %v2976_v3 }
 0x149   : > { %v3795_v0 = vsub.f32 %v2421_v8, %v503_v49  ;;  %645 = vadd.xlane.f32.xlu0 %v589_v2  ;;  %599 = vadd.xlane.f32.xlu1 %v566_v50 }
 0x14a   : > { %v3799_v1 = vsub.f32 %v2422_v9, %v504_v51  ;;  %v489_v5 = vpop.xlane.xlu0 %488 }
 0x14b   : > { %v491_v52 = vpop.xlane.xlu1 %490  ;;  %v527_v53 = vmul.f32 0.0078125, %v489_v5  ;;  %v567_v54 = vmul.f32 %v3795_v0, %v3795_v0 }
 0x14c   : > { %v528_v57 = vmul.f32 0.0078125, %v491_v52  ;;  %v568_v9 = vmul.f32 %v3799_v1, %v3799_v1 }
 0x14d   : > { %v3807_v8 = vsub.f32 %v2469_v11, %v527_v53  ;;  %647 = vadd.xlane.f32.xlu1 %v590_v4  ;;  %601 = vadd.xlane.f32.xlu0 %v567_v54  ;;  %v2979_v54 = vld [vmem:[#allocation8 + $0x30] ss:$12 sps:$4 sm:$0xff]  }
 0x14e   : > { %v3811_v6 = vsub.f32 %v2470_v12, %v528_v57  ;;  %v445_v58 = vpop.xlane.xlu0 %444 }
 0x14f   : > { %v447_v59 = vpop.xlane.xlu1 %446  ;;  %v505_v60 = vmul.f32 0.0078125, %v445_v58  ;;  %v591_v61 = vmul.f32 %v3807_v8, %v3807_v8 }
 0x150   : > { %v506_v2 = vmul.f32 0.0078125, %v447_v59  ;;  %v592_v12 = vmul.f32 %v3811_v6, %v3811_v6  ;;  %v2980_v59 = vld [vmem:[#allocation8 + $0x4c] ss:$12 sps:$4 sm:$0xff]  }
 0x151   : > { %v3819_v11 = vsub.f32 %v2425_v13, %v505_v60  ;;  %603 = vadd.xlane.f32.xlu1 %v568_v9  ;;  %649 = vadd.xlane.f32.xlu0 %v591_v61  ;;  %v2977_v13 = vld [vmem:[#allocation8 + $0x34] ss:$12 sps:$4 sm:$0xff]  }
 0x152   : > { %v3823_v7 = vsub.f32 %v2426_v14, %v506_v2  ;;  %v493_v48 = vpop.xlane.xlu0 %492  ;;  %1075 = vmatprep.subr.bf16.mxu0 %v2977_v13  ;;  %2853 = vmatprep.subr.bf16.mxu1 %v2977_v13  ;;  %v2982_v2 = vld [vmem:[#allocation8 + $0x48] ss:$12 sps:$4 sm:$0xff]  }
 0x153   : > { %v495_v49 = vpop.xlane.xlu1 %494  ;;  %v529_v50 = vmul.f32 0.0078125, %v493_v48  ;;  %v569_v51 = vmul.f32 %v3819_v11, %v3819_v11  ;;  %1076 = vmatpush1.bf16.msra.mxu0 %v2979_v54  ;;  %2861 = vmatpush1.bf16.msra.mxu1 %v2979_v54 }
 0x154   : > { %v530_v4 = vmul.f32 0.0078125, %v495_v49  ;;  %v570_v14 = vmul.f32 %v3823_v7, %v3823_v7  ;;  %1077 = vmatprep.subr.bf16.mxu0 %v2980_v59  ;;  %2854 = vmatprep.subr.bf16.mxu1 %v2980_v59  ;;  %v2983_v49 = vld [vmem:[#allocation8 + $0x64] ss:$12 sps:$4 sm:$0xff]  }
 0x155   : > { %v3831_v5 = vsub.f32 %v2473_v16, %v529_v50  ;;  %651 = vadd.xlane.f32.xlu1 %v592_v12  ;;  %605 = vadd.xlane.f32.xlu0 %v569_v51 }
 0x156   : > { %v3835_v10 = vsub.f32 %v2474_v17, %v530_v4  ;;  %v449_v52 = vpop.xlane.xlu0 %448  ;;  %v2985_v4 = vld [vmem:[#allocation8 + $0x60] ss:$12 sps:$4 sm:$0xff]  }
 0x157   : > { %v451_v53 = vpop.xlane.xlu1 %450  ;;  %v507_v57 = vmul.f32 0.0078125, %v449_v52  ;;  %v593_v9 = vmul.f32 %v3831_v5, %v3831_v5  ;;  %1078 = vmatpush1.bf16.msra.mxu0 %v2982_v2  ;;  %2862 = vmatpush1.bf16.msra.mxu1 %v2982_v2 }
 0x158   : > { %v508_v16 = vmul.f32 0.0078125, %v451_v53  ;;  %v594_v58 = vmul.f32 %v3835_v10, %v3835_v10  ;;  %1079 = vmatprep.subr.bf16.mxu0 %v2983_v49  ;;  %2855 = vmatprep.subr.bf16.mxu1 %v2983_v49  ;;  %v2986_v53 = vld [vmem:[#allocation8 + $0x7c] ss:$12 sps:$4 sm:$0xff]   ;;  %v2992_v49 = vld [vmem:[#allocation8 + $0xac] ss:$12 sps:$4 sm:$0xff]  }
 0x159   : > { %v3843_v15 = vsub.f32 %v2429_v19, %v507_v57  ;;  %607 = vadd.xlane.f32.xlu1 %v570_v14  ;;  %653 = vadd.xlane.f32.xlu0 %v593_v9  ;;  %v2988_v9 = vld [vmem:[#allocation8 + $0x78] ss:$12 sps:$4 sm:$0xff]  }
 0x15a   : > { %v3847_v17 = vsub.f32 %v2430_v20, %v508_v16  ;;  %v497_v60 = vpop.xlane.xlu0 %496 }
 0x15b   : > { %v499_v61 = vpop.xlane.xlu1 %498  ;;  %v531_v12 = vmul.f32 0.0078125, %v497_v60  ;;  %v571_v3 = vmul.f32 %v3843_v15, %v3843_v15  ;;  %1080 = vmatpush1.bf16.msra.mxu0 %v2985_v4  ;;  %2863 = vmatpush1.bf16.msra.mxu1 %v2985_v4  ;;  %v2989_v60 = vld [vmem:[#allocation8 + $0x94] ss:$12 sps:$4 sm:$0xff]  }
 0x15c   : > { %v532_v48 = vmul.f32 0.0078125, %v499_v61  ;;  %v572_v20 = vmul.f32 %v3847_v17, %v3847_v17  ;;  %1081 = vmatprep.subr.bf16.mxu0 %v2986_v53  ;;  %2856 = vmatprep.subr.bf16.mxu1 %v2986_v53  ;;  %v2994_v4 = vld [vmem:[#allocation8 + $0xa8] ss:$12 sps:$4 sm:$0xff]  }
 0x15d   : > { %v3855_v18 = vsub.f32 %v2477_v22, %v531_v12  ;;  %655 = vadd.xlane.f32.xlu1 %v594_v58  ;;  %609 = vadd.xlane.f32.xlu0 %v571_v3  ;;  %v2991_v12 = vld [vmem:[#allocation8 + $0x90] ss:$12 sps:$4 sm:$0xff]  }
 0x15e   : > { %v3859_v19 = vsub.f32 %v2478_v23, %v532_v48  ;;  %v453_v50 = vpop.xlane.xlu0 %452 }
 0x15f   : > { %v455_v51 = vpop.xlane.xlu1 %454  ;;  %v509_v13 = vmul.f32 0.0078125, %v453_v50  ;;  %v595_v14 = vmul.f32 %v3855_v18, %v3855_v18  ;;  %1082 = vmatpush1.bf16.msra.mxu0 %v2988_v9  ;;  %2864 = vmatpush1.bf16.msra.mxu1 %v2988_v9 }
 0x160   : > { %v510_v52 = vmul.f32 0.0078125, %v455_v51  ;;  %v596_v23 = vmul.f32 %v3859_v19, %v3859_v19  ;;  %1083 = vmatprep.subr.bf16.mxu0 %v2989_v60  ;;  %2857 = vmatprep.subr.bf16.mxu1 %v2989_v60 }
 0x161   : > { %v3867_v21 = vsub.f32 %v2433_v25, %v509_v13  ;;  %611 = vadd.xlane.f32.xlu1 %v572_v20  ;;  %657 = vadd.xlane.f32.xlu0 %v595_v14 }
 0x162   : > { %v3871_v22 = vsub.f32 %v2434_v26, %v510_v52  ;;  %v457_v54 = vpop.xlane.xlu0 %456 }
 0x163   : > { %v459_v57 = vpop.xlane.xlu1 %458  ;;  %v511_v16 = vmul.f32 0.0078125, %v457_v54  ;;  %v573_v58 = vmul.f32 %v3867_v21, %v3867_v21  ;;  %1084 = vmatpush1.bf16.msra.mxu0 %v2991_v12  ;;  %2865 = vmatpush1.bf16.msra.mxu1 %v2991_v12  ;;  %v3354_v54 = vmov 0  }
 0x164   : > { %v512_v59 = vmul.f32 0.0078125, %v459_v57  ;;  %v574_v26 = vmul.f32 %v3871_v22, %v3871_v22  ;;  %1085 = vmatprep.subr.bf16.mxu0 %v2992_v49  ;;  %2858 = vmatprep.subr.bf16.mxu1 %v2992_v49 }
 0x165   : > { %v3879_v24 = vsub.f32 %v2437_v28, %v511_v16  ;;  %659 = vadd.xlane.f32.xlu1 %v596_v23  ;;  %613 = vadd.xlane.f32.xlu0 %v573_v58  ;;  %v3925_v58 = vld [vmem:[#allocation8 + $0x8] ss:$12 sps:$4 sm:$0xff]  }
 0x166   : > { %v3883_v25 = vsub.f32 %v2438_v29, %v512_v59  ;;  %v461_v61 = vpop.xlane.xlu0 %460  ;;  %1103 = vmatprep.mubr.bf16.mxu0 %v3354_v54  ;;  %1223 = vmatprep.mubr.bf16.mxu1 %v3354_v54 }
 0x167   : > { %v463_v2 = vpop.xlane.xlu1 %462  ;;  %v513_v3 = vmul.f32 0.0078125, %v461_v61  ;;  %v575_v48 = vmul.f32 %v3879_v24, %v3879_v24  ;;  %1086 = vmatpush1.bf16.msra.mxu0 %v2994_v4  ;;  %2866 = vmatpush1.bf16.msra.mxu1 %v2994_v4 }
 0x168   : > { %v514_v20 = vmul.f32 0.0078125, %v463_v2  ;;  %v576_v29 = vmul.f32 %v3883_v25, %v3883_v25  ;;  %2803 = vmatprep.subr.bf16.mxu1 %v3925_v58 }
 0x169   : > { %v3891_v27 = vsub.f32 %v2441_v31, %v513_v3  ;;  %615 = vadd.xlane.f32.xlu1 %v574_v26  ;;  %617 = vadd.xlane.f32.xlu0 %v575_v48 }
 0x16a   : > { %v3895_v28 = vsub.f32 %v2442_v32, %v514_v20  ;;  %v465_v50 = vpop.xlane.xlu0 %464 }
 0x16b   : > { %v467_v51 = vpop.xlane.xlu1 %466  ;;  %v515_v13 = vmul.f32 0.0078125, %v465_v50  ;;  %v577_v14 = vmul.f32 %v3891_v27, %v3891_v27 }
 0x16c   : > { %v516_v52 = vmul.f32 0.0078125, %v467_v51  ;;  %v578_v32 = vmul.f32 %v3895_v28, %v3895_v28 }
 0x16d   : > { %v3903_v30 = vsub.f32 %v2445_v34, %v515_v13  ;;  %619 = vadd.xlane.f32.xlu1 %v576_v29  ;;  %621 = vadd.xlane.f32.xlu0 %v577_v14 }
 0x16e   : > { %v3907_v31 = vsub.f32 %v2446_v35, %v516_v52  ;;  %v469_v23 = vpop.xlane.xlu0 %468 }
 0x16f   : > { %v471_v53 = vpop.xlane.xlu1 %470  ;;  %v517_v57 = vmul.f32 0.0078125, %v469_v23  ;;  %v579_v34 = vmul.f32 %v3903_v30, %v3903_v30 }
 0x170   : > { %v518_v9 = vmul.f32 0.0078125, %v471_v53  ;;  %v580_v16 = vmul.f32 %v3907_v31, %v3907_v31 }
 0x171   : > { %v3917_v33 = vsub.f32 %v2449_v37, %v517_v57  ;;  %623 = vadd.xlane.f32.xlu1 %v578_v32  ;;  %625 = vadd.xlane.f32.xlu0 %v579_v34 }
 0x172   : > { %v3921_v35 = vsub.f32 %v2450_v38, %v518_v9  ;;  %v473_v59 = vpop.xlane.xlu0 %472 }
 0x173   : > { %v475_v26 = vpop.xlane.xlu1 %474  ;;  %v519_v60 = vmul.f32 0.0078125, %v473_v59  ;;  %v581_v61 = vmul.f32 %v3917_v33, %v3917_v33 }
 0x174   : > { %v520_v2 = vmul.f32 0.0078125, %v475_v26  ;;  %v582_v38 = vmul.f32 %v3921_v35, %v3921_v35 }
 0x175   : > { %v3932_v37 = vsub.f32 %v2453_v40, %v519_v60  ;;  %627 = vadd.xlane.f32.xlu1 %v580_v16  ;;  %629 = vadd.xlane.f32.xlu0 %v581_v61  ;;  %v3968_v60 = vshrl.u32 %v791_v45, 7 }
 0x176   : > { %v3936_v36 = vsub.f32 %v2454_v41, %v520_v2  ;;  %v477_v12 = vpop.xlane.xlu0 %476 }
 0x177   : > { %v479_v3 = vpop.xlane.xlu1 %478  ;;  %v521_v48 = vmul.f32 0.0078125, %v477_v12  ;;  %v583_v20 = vmul.f32 %v3932_v37, %v3932_v37 }
 0x178   : > { %v522_v29 = vmul.f32 0.0078125, %v479_v3  ;;  %v584_v41 = vmul.f32 %v3936_v36, %v3936_v36 }
 0x179   : > { %v3944_v40 = vsub.f32 %v2457_v43, %v521_v48  ;;  %631 = vadd.xlane.f32.xlu1 %v582_v38  ;;  %633 = vadd.xlane.f32.xlu0 %v583_v20  ;;  %v789_v38 = vld [vmem:[#allocation5] sm:$0x1] }
 0x17a   : > { %v3948_v39 = vsub.f32 %v2458_v44, %v522_v29  ;;  %v481_v49 = vpop.xlane.xlu0 %480  ;;  %v790_v29 = vunpack.c.l.bf16 %v789_v38 }
 0x17b   : > { %v483_v50 = vpop.xlane.xlu1 %482  ;;  %v523_v51 = vmul.f32 0.0078125, %v481_v49  ;;  %v585_v4 = vmul.f32 %v3944_v40, %v3944_v40 }
 0x17c   : > { %v524_v13 = vmul.f32 0.0078125, %v483_v50  ;;  %v586_v44 = vmul.f32 %v3948_v39, %v3948_v39 }
 0x17d   : > { %v3956_v43 = vsub.f32 %v2461_v46, %v523_v51  ;;  %635 = vadd.xlane.f32.xlu1 %v584_v41  ;;  %637 = vadd.xlane.f32.xlu0 %v585_v4  ;;  %v3971_v41 = vsub.s32 0, %v3968_v60  ;;  %v827_v51 = vld [vmem:[#allocation7] sm:$0x1] }
 0x17e   : > { %v3960_v42 = vsub.f32 %v2462_v47, %v524_v13 }
 0x17f   : > { %v587_v14 = vmul.f32 %v3956_v43, %v3956_v43 }
 0x180   : > { %v588_v52 = vmul.f32 %v3960_v42, %v3960_v42 }
 0x181   : > { %639 = vadd.xlane.f32.xlu1 %v586_v44  ;;  %641 = vadd.xlane.f32.xlu0 %v587_v14 }
 0x185   : > { %643 = vadd.xlane.f32.xlu1 %v588_v52 }
 0x1d2   : > { %v598_v46 = vpop.xlane.xlu0 %597 }
 0x1d3   : > { %v661_v32 = vmul.f32 0.0078125, %v598_v46 }
 0x1d5   : > { %v693_v23 = vadd.f32 1e-05, %v661_v32  ;;  %v3975_v32 = vrot.slane %v790_v29, %v3971_v41 }
 0x1d6   : > { %v600_v53 = vpop.xlane.xlu1 %599  ;;  %v646_v57 = vpop.xlane.xlu0 %645 }
 0x1d7   : > { %3003 = vrsqrt.f32 %v693_v23  ;;  %v662_v47 = vmul.f32 0.0078125, %v600_v53  ;;  %v685_v34 = vmul.f32 0.0078125, %v646_v57  ;;  %v828_v23 = vunpack.c.l.bf16 %v827_v51 }
 0x1d9   : > { %v694_v9 = vadd.f32 1e-05, %v662_v47  ;;  %v717_v16 = vadd.f32 1e-05, %v685_v34 }
 0x1da   : > { %v648_v59 = vpop.xlane.xlu1 %647  ;;  %v602_v26 = vpop.xlane.xlu0 %601 }
 0x1db   : > { %3005 = vrsqrt.f32 %v694_v9  ;;  %v686_v61 = vmul.f32 0.0078125, %v648_v59  ;;  %v663_v2 = vmul.f32 0.0078125, %v602_v26 }
 0x1dc   : > { %3007 = vrsqrt.f32 %v717_v16 }
 0x1dd   : > { %v718_v12 = vadd.f32 1e-05, %v686_v61  ;;  %v695_v3 = vadd.f32 1e-05, %v663_v2 }
 0x1de   : > { %v604_v48 = vpop.xlane.xlu1 %603  ;;  %v650_v20 = vpop.xlane.xlu0 %649 }
 0x1df   : > { %3009 = vrsqrt.f32 %v718_v12  ;;  %v664_v49 = vmul.f32 0.0078125, %v604_v48  ;;  %v687_v50 = vmul.f32 0.0078125, %v650_v20 }
 0x1e0   : > { %3011 = vrsqrt.f32 %v695_v3 }
 0x1e1   : > { %v3004_v4 = vpop.eup %3003  ;;  %v696_v13 = vadd.f32 1e-05, %v664_v49  ;;  %v719_v44 = vadd.f32 1e-05, %v687_v50 }
 0x1e2   : > { %v652_v14 = vpop.xlane.xlu1 %651  ;;  %v606_v52 = vpop.xlane.xlu0 %605  ;;  %v757_v46 = vmul.f32 %v3004_v4, %v3773_v55  ;;  %v3980_v55 = vrot.slane %v828_v23, %v3971_v41 }
 0x1e3   : > { %3013 = vrsqrt.f32 %v696_v13  ;;  %v688_v53 = vmul.f32 0.0078125, %v652_v14  ;;  %v665_v57 = vmul.f32 0.0078125, %v606_v52 }
 0x1e4   : > { %3015 = vrsqrt.f32 %v719_v44  ;;  %v795_v61 = vmul.f32 %v3975_v32, %v757_v46 }
 0x1e5   : > { %v3006_v45 = vpop.eup %3005  ;;  %v720_v47 = vadd.f32 1e-05, %v688_v53  ;;  %v697_v34 = vadd.f32 1e-05, %v665_v57 }
 0x1e6   : > { %v3008_v9 = vpop.eup %3007  ;;  %v608_v16 = vpop.xlane.xlu1 %607  ;;  %v758_v26 = vmul.f32 %v3006_v45, %v3783_v62  ;;  %v833_v62 = vadd.f32 %v3980_v55, %v795_v61 }
 0x1e7   : > { %v654_v59 = vpop.xlane.xlu0 %653  ;;  %3017 = vrsqrt.f32 %v720_v47  ;;  %v666_v2 = vmul.f32 0.0078125, %v608_v16  ;;  %v781_v12 = vmul.f32 %v3008_v9, %v3777_v56 }
 0x1e8   : > { %v689_v38 = vmul.f32 0.0078125, %v654_v59  ;;  %3019 = vrsqrt.f32 %v697_v34  ;;  %v796_v3 = vmul.f32 %v3975_v32, %v758_v26 }
 0x1e9   : > { %v3010_v48 = vpop.eup %3009  ;;  %v698_v20 = vadd.f32 1e-05, %v666_v2  ;;  %v819_v44 = vmul.f32 %v3975_v32, %v781_v12  ;;  %v2996_v12 = vld [vmem:[#allocation8 + $0x20] ss:$12 sps:$4 sm:$0xff]  }
 0x1ea   : > { %v721_v29 = vadd.f32 1e-05, %v689_v38  ;;  %v3012_v49 = vpop.eup %3011  ;;  %v656_v50 = vpop.xlane.xlu1 %655  ;;  %v834_v4 = vadd.f32 %v3980_v55, %v796_v3  ;;  %v782_v13 = vmul.f32 %v3010_v48, %v3787_v63 }
 0x1eb   : > { %v610_v51 = vpop.xlane.xlu0 %609  ;;  %3021 = vrsqrt.f32 %v698_v20  ;;  %v690_v14 = vmul.f32 0.0078125, %v656_v50  ;;  %v759_v23 = vmul.f32 %v3012_v49, %v3795_v0  ;;  %v857_v9 = vadd.f32 %v3980_v55, %v819_v44 }
 0x1ec   : > { %v667_v56 = vmul.f32 0.0078125, %v610_v51  ;;  %3023 = vrsqrt.f32 %v721_v29  ;;  %v3988_v52 = vpack.c.bf16 %v834_v4, %v833_v62  ;;  %v820_v46 = vmul.f32 %v3975_v32, %v782_v13 }
 0x1ed   : > { %v3014_v53 = vpop.eup %3013  ;;  %v722_v57 = vadd.f32 1e-05, %v690_v14  ;;  %v797_v26 = vmul.f32 %v3975_v32, %v759_v23 }
 0x1ee   : > { %v699_v45 = vadd.f32 1e-05, %v667_v56  ;;  %v3016_v47 = vpop.eup %3015  ;;  %v612_v34 = vpop.xlane.xlu1 %611  ;;  %1104 = vmatmul.mubr.bf16.vlgmr.msra.gmra.mrb[0].mxu0 %v3988_v52  ;;  %v858_v16 = vadd.f32 %v3980_v55, %v820_v46  ;;  %v760_v59 = vmul.f32 %v3014_v53, %v3799_v1  ;;  %v2997_v56 = vld [vmem:[#allocation8 + $0x38] ss:$12 sps:$4 sm:$0xff]  }
 0x1ef   : > { %v658_v63 = vpop.xlane.xlu0 %657  ;;  %3025 = vrsqrt.f32 %v722_v57  ;;  %v668_v61 = vmul.f32 0.0078125, %v612_v34  ;;  %1113 = vmatprep.mubr.bf16.mxu0 %v3354_v54  ;;  %v783_v0 = vmul.f32 %v3016_v47, %v3807_v8  ;;  %v835_v51 = vadd.f32 %v3980_v55, %v797_v26 }
 0x1f0   : > { %v691_v2 = vmul.f32 0.0078125, %v658_v63  ;;  %3027 = vrsqrt.f32 %v699_v45  ;;  %v3999_v38 = vpack.c.bf16 %v858_v16, %v857_v9  ;;  %v798_v3 = vmul.f32 %v3975_v32, %v760_v59 }
 0x1f1   : > { %v3018_v48 = vpop.eup %3017  ;;  %v700_v20 = vadd.f32 1e-05, %v668_v61  ;;  %v821_v4 = vmul.f32 %v3975_v32, %v783_v0 }
 0x1f2   : > { %v723_v29 = vadd.f32 1e-05, %v691_v2  ;;  %v3020_v49 = vpop.eup %3019  ;;  %v660_v1 = vpop.xlane.xlu1 %659  ;;  %1224 = vmatmul.mubr.bf16.vlgmr.msra.gmra.mrb[0].mxu1 %v3999_v38  ;;  %v836_v62 = vadd.f32 %v3980_v55, %v798_v3  ;;  %v784_v8 = vmul.f32 %v3018_v48, %v3811_v6  ;;  %v2998_v2 = vld [vmem:[#allocation8 + $0x50] ss:$12 sps:$4 sm:$0xff]  }
 0x1f3   : > { %v614_v50 = vpop.xlane.xlu0 %613  ;;  %3029 = vrsqrt.f32 %v700_v20  ;;  %v692_v13 = vmul.f32 0.0078125, %v660_v1  ;;  %2804 = vmatpush3.bf16.msra.mxu1 %v3925_v58  ;;  %1233 = vmatprep.mubr.bf16.mxu1 %v3354_v54  ;;  %v761_v23 = vmul.f32 %v3020_v49, %v3819_v11  ;;  %v859_v34 = vadd.f32 %v3980_v55, %v821_v4 }
 0x1f4   : > { %v669_v44 = vmul.f32 0.0078125, %v614_v50  ;;  %3031 = vrsqrt.f32 %v723_v29  ;;  %2805 = vmatprep.subr.bf16.mxu1 %v2996_v12  ;;  %v4009_v14 = vpack.c.bf16 %v836_v62, %v835_v51  ;;  %v822_v46 = vmul.f32 %v3975_v32, %v784_v8  ;;  %v2999_v8 = vld [vmem:[#allocation8 + $0x68] ss:$12 sps:$4 sm:$0xff]  }
 0x1f5   : > { %v3022_v53 = vpop.eup %3021  ;;  %v724_v6 = vadd.f32 1e-05, %v692_v13  ;;  %v799_v16 = vmul.f32 %v3975_v32, %v761_v23 }
 0x1f6   : > { %v701_v57 = vadd.f32 1e-05, %v669_v44  ;;  %v3024_v45 = vpop.eup %3023  ;;  %v616_v47 = vpop.xlane.xlu1 %615  ;;  %1114 = vmatmul.mubr.bf16.gmra.mrb[4].mxu0 %v4009_v14  ;;  %v860_v63 = vadd.f32 %v3980_v55, %v822_v46  ;;  %v762_v9 = vmul.f32 %v3022_v53, %v3823_v7 }
 0x1f7   : > { %v618_v58 = vpop.xlane.xlu0 %617  ;;  %3033 = vrsqrt.f32 %v724_v6  ;;  %v670_v59 = vmul.f32 0.0078125, %v616_v47  ;;  %2806 = vmatpush3.bf16.msra.mxu1 %v2996_v12  ;;  %1123 = vmatprep.mubr.bf16.mxu0 %v3354_v54  ;;  %v785_v26 = vmul.f32 %v3024_v45, %v3831_v5  ;;  %v837_v49 = vadd.f32 %v3980_v55, %v799_v16 }
 0x1f8   : > { %v671_v11 = vmul.f32 0.0078125, %v618_v58  ;;  %3035 = vrsqrt.f32 %v701_v57  ;;  %2807 = vmatprep.subr.bf16.mxu1 %v2997_v56  ;;  %v4020_v61 = vpack.c.bf16 %v860_v63, %v859_v34  ;;  %v800_v0 = vmul.f32 %v3975_v32, %v762_v9  ;;  %v3000_v63 = vld [vmem:[#allocation8 + $0x80] ss:$12 sps:$4 sm:$0xff]  }
 0x1f9   : > { %v3026_v3 = vpop.eup %3025  ;;  %v702_v48 = vadd.f32 1e-05, %v670_v59  ;;  %v823_v50 = vmul.f32 %v3975_v32, %v785_v26 }
 0x1fa   : > { %v703_v7 = vadd.f32 1e-05, %v671_v11  ;;  %v3028_v20 = vpop.eup %3027  ;;  %v620_v29 = vpop.xlane.xlu1 %619  ;;  %1234 = vmatmul.mubr.bf16.gmra.mrb[4].mxu1 %v4020_v61  ;;  %v838_v1 = vadd.f32 %v3980_v55, %v800_v0  ;;  %v786_v5 = vmul.f32 %v3026_v3, %v3835_v10 }
 0x1fb   : > { %v622_v12 = vpop.xlane.xlu0 %621  ;;  %3037 = vrsqrt.f32 %v702_v48  ;;  %v672_v51 = vmul.f32 0.0078125, %v620_v29  ;;  %2808 = vmatpush3.bf16.msra.mxu1 %v2997_v56  ;;  %1243 = vmatprep.mubr.bf16.mxu1 %v3354_v54  ;;  %v763_v13 = vmul.f32 %v3028_v20, %v3843_v15  ;;  %v861_v56 = vadd.f32 %v3980_v55, %v823_v50  ;;  %v3001_v29 = vld [vmem:[#allocation8 + $0x98] ss:$12 sps:$4 sm:$0xff]  }
 0x1fc   : > { %3039 = vrsqrt.f32 %v703_v7  ;;  %2809 = vmatprep.subr.bf16.mxu1 %v2998_v2  ;;  %v4029_v62 = vpack.c.bf16 %v838_v1, %v837_v49  ;;  %v824_v4 = vmul.f32 %v3975_v32, %v786_v5  ;;  %v673_v23 = vmul.f32 0.0078125, %v622_v12 }
 0x1fd   : > { %v3030_v44 = vpop.eup %3029  ;;  %v704_v46 = vadd.f32 1e-05, %v672_v51  ;;  %v801_v47 = vmul.f32 %v3975_v32, %v763_v13 }
 0x1fe   : > { %v3032_v10 = vpop.eup %3031  ;;  %v624_v53 = vpop.xlane.xlu1 %623  ;;  %1124 = vmatmul.mubr.bf16.gmra.mrb[8].mxu0 %v4029_v62  ;;  %v862_v57 = vadd.f32 %v3980_v55, %v824_v4  ;;  %v764_v45 = vmul.f32 %v3030_v44, %v3847_v17  ;;  %v705_v59 = vadd.f32 1e-05, %v673_v23 }
 0x1ff   : > { %v626_v6 = vpop.xlane.xlu0 %625  ;;  %3041 = vrsqrt.f32 %v704_v46  ;;  %v674_v58 = vmul.f32 0.0078125, %v624_v53  ;;  %2810 = vmatpush3.bf16.msra.mxu1 %v2998_v2  ;;  %1133 = vmatprep.mubr.bf16.mxu0 %v3354_v54  ;;  %v787_v15 = vmul.f32 %v3032_v10, %v3855_v18  ;;  %v839_v2 = vadd.f32 %v3980_v55, %v801_v47  ;;  %v3002_v53 = vld [vmem:[#allocation8 + $0xb0] ss:$12 sps:$4 sm:$0xff]  }
 0x200   : > { %2811 = vmatprep.subr.bf16.mxu1 %v2999_v8  ;;  %v4040_v34 = vpack.c.bf16 %v862_v57, %v861_v56  ;;  %v802_v9 = vmul.f32 %v3975_v32, %v764_v45  ;;  %v675_v5 = vmul.f32 0.0078125, %v626_v6 }
 0x201   : > { %v3034_v16 = vpop.eup %3033  ;;  %v706_v11 = vadd.f32 1e-05, %v674_v58  ;;  %v825_v48 = vmul.f32 %v3975_v32, %v787_v15 }
 0x202   : > { %v3036_v26 = vpop.eup %3035  ;;  %v628_v17 = vpop.xlane.xlu1 %627  ;;  %1244 = vmatmul.mubr.bf16.gmra.mrb[8].mxu1 %v4040_v34  ;;  %v840_v3 = vadd.f32 %v3980_v55, %v802_v9  ;;  %v788_v18 = vmul.f32 %v3034_v16, %v3859_v19  ;;  %v707_v57 = vadd.f32 1e-05, %v675_v5 }
 0x203   : > { %v630_v0 = vpop.xlane.xlu0 %629  ;;  %3043 = vrsqrt.f32 %v706_v11  ;;  %v676_v7 = vmul.f32 0.0078125, %v628_v17  ;;  %2812 = vmatpush3.bf16.msra.mxu1 %v2999_v8  ;;  %1253 = vmatprep.mubr.bf16.mxu1 %v3354_v54  ;;  %v765_v49 = vmul.f32 %v3036_v26, %v3867_v21  ;;  %v863_v8 = vadd.f32 %v3980_v55, %v825_v48 }
 0x204   : > { %2813 = vmatprep.subr.bf16.mxu1 %v3000_v63  ;;  %v4049_v20 = vpack.c.bf16 %v840_v3, %v839_v2  ;;  %v826_v12 = vmul.f32 %v3975_v32, %v788_v18  ;;  %3045 = vrsqrt.f32 %v705_v59  ;;  %v677_v45 = vmul.f32 0.0078125, %v630_v0 }
 0x205   : > { %v3038_v1 = vpop.eup %3037  ;;  %v803_v44 = vmul.f32 %v3975_v32, %v765_v49  ;;  %v708_v46 = vadd.f32 1e-05, %v676_v7 }
 0x206   : > { %v3040_v50 = vpop.eup %3039  ;;  %v632_v19 = vpop.xlane.xlu1 %631  ;;  %1134 = vmatmul.mubr.bf16.gmra.mrb[12].mxu0 %v4049_v20  ;;  %v864_v4 = vadd.f32 %v3980_v55, %v826_v12  ;;  %v766_v13 = vmul.f32 %v3038_v1, %v3871_v22  ;;  %v709_v18 = vadd.f32 1e-05, %v677_v45 }
 0x207   : > { %v634_v51 = vpop.xlane.xlu0 %633  ;;  %v678_v23 = vmul.f32 0.0078125, %v632_v19  ;;  %2814 = vmatpush3.bf16.msra.mxu1 %v3000_v63  ;;  %1143 = vmatprep.mubr.bf16.mxu0 %v3354_v54  ;;  %v767_v22 = vmul.f32 %v3040_v50, %v3879_v24  ;;  %v841_v9 = vadd.f32 %v3980_v55, %v803_v44  ;;  %3047 = vrsqrt.f32 %v708_v46 }
 0x208   : > { %v679_v21 = vmul.f32 0.0078125, %v634_v51  ;;  %2815 = vmatprep.subr.bf16.mxu1 %v3001_v29  ;;  %v4059_v10 = vpack.c.bf16 %v864_v4, %v863_v8  ;;  %v804_v6 = vmul.f32 %v3975_v32, %v766_v13 }
 0x209   : > { %v3042_v56 = vpop.eup %3041  ;;  %v710_v58 = vadd.f32 1e-05, %v678_v23  ;;  %v805_v7 = vmul.f32 %v3975_v32, %v767_v22 }
 0x20a   : > { %v711_v47 = vadd.f32 1e-05, %v679_v21  ;;  %v636_v15 = vpop.xlane.xlu1 %635  ;;  %1254 = vmatmul.mubr.bf16.gmra.mrb[12].mxu1 %v4059_v10  ;;  %v842_v16 = vadd.f32 %v3980_v55, %v804_v6  ;;  %v768_v59 = vmul.f32 %v3042_v56, %v3883_v25 }
 0x20b   : > { %v638_v63 = vpop.xlane.xlu0 %637  ;;  %v680_v11 = vmul.f32 0.0078125, %v636_v15  ;;  %2816 = vmatpush3.bf16.msra.mxu1 %v3001_v29  ;;  %2819 = vmatprep.mubr.bf16.mxu1 %v3988_v52  ;;  %v843_v51 = vadd.f32 %v3980_v55, %v805_v7 }
 0x20c   : > { %v681_v26 = vmul.f32 0.0078125, %v638_v63  ;;  %3049 = vrsqrt.f32 %v711_v47  ;;  %2817 = vmatprep.subr.bf16.mxu1 %v3002_v53  ;;  %v869_v24 = vpack.c.bf16 %v842_v16, %v841_v9  ;;  %v806_v17 = vmul.f32 %v3975_v32, %v768_v59 }
 0x20d   : > { %v3044_v0 = vpop.eup %3043  ;;  %3051 = vrsqrt.f32 %v707_v57  ;;  %v712_v2 = vadd.f32 1e-05, %v680_v11 }
 0x20e   : > { %v713_v3 = vadd.f32 1e-05, %v681_v26  ;;  %3053 = vrsqrt.f32 %v710_v58  ;;  %v640_v48 = vpop.xlane.xlu1 %639  ;;  %1144 = vmatmul.mubr.bf16.gmra.mrb[16].mxu0 %v869_v24  ;;  %v3046_v29 = vpop.eup %3045  ;;  %v844_v49 = vadd.f32 %v3980_v55, %v806_v17  ;;  %v770_v1 = vmul.f32 %v3044_v0, %v3895_v28 }
 0x20f   : > { %v642_v25 = vpop.xlane.xlu0 %641  ;;  %3055 = vrsqrt.f32 %v712_v2  ;;  %v682_v12 = vmul.f32 0.0078125, %v640_v48  ;;  %2818 = vmatpush3.bf16.msra.mxu1 %v3002_v53  ;;  %1153 = vmatprep.mubr.bf16.mxu0 %v3354_v54  ;;  %v769_v8 = vmul.f32 %v3046_v29, %v3891_v27 }
 0x210   : > { %v683_v52 = vmul.f32 0.0078125, %v642_v25  ;;  %3057 = vrsqrt.f32 %v713_v3  ;;  %v870_v13 = vpack.c.bf16 %v844_v49, %v843_v51  ;;  %v808_v44 = vmul.f32 %v3975_v32, %v770_v1 }
 0x211   : > { %v714_v5 = vadd.f32 1e-05, %v682_v12  ;;  %3059 = vrsqrt.f32 %v709_v18  ;;  %v3048_v46 = vpop.eup %3047  ;;  %v807_v21 = vmul.f32 %v3975_v32, %v769_v8  ;;  %v922_v51 = vsub.s32 2, %v3968_v60 }
 0x212   : > { %v715_v50 = vadd.f32 1e-05, %v683_v52  ;;  %v644_v19 = vpop.xlane.xlu1 %643  ;;  %2820 = vmatmul.mubr.bf16.vlgmr.msra.gmra.mrb[16].mxu1 %v4009_v14  ;;  %v846_v6 = vadd.f32 %v3980_v55, %v808_v44 }
 0x213   : > { %3061 = vrsqrt.f32 %v714_v5  ;;  %v684_v4 = vmul.f32 0.0078125, %v644_v19  ;;  %2823 = vmatprep.mubr.bf16.mxu1 %v4029_v62  ;;  %v772_v62 = vmul.f32 %v3048_v46, %v3907_v31  ;;  %v845_v47 = vadd.f32 %v3980_v55, %v807_v21 }
 0x214   : > { %3063 = vrsqrt.f32 %v715_v50 }
 0x215   : > { %v716_v28 = vadd.f32 1e-05, %v684_v4  ;;  %v871_v9 = vpack.c.bf16 %v846_v6, %v845_v47  ;;  %v810_v31 = vmul.f32 %v3975_v32, %v772_v62 }
 0x216   : > { %v3050_v23 = vpop.eup %3049  ;;  %1154 = vmatmul.mubr.bf16.gmra.mrb[20].mxu0 %v870_v13 }
 0x217   : > { %v3052_v53 = vpop.eup %3051  ;;  %3065 = vrsqrt.f32 %v716_v28  ;;  %1163 = vmatprep.mubr.bf16.mxu0 %v3354_v54  ;;  %v775_v27 = vmul.f32 %v3050_v23, %v3932_v37 }
 0x218   : > { %v3054_v14 = vpop.eup %3053  ;;  %v771_v22 = vmul.f32 %v3052_v53, %v3903_v30 }
 0x219   : > { %v3056_v56 = vpop.eup %3055  ;;  %v813_v57 = vmul.f32 %v3975_v32, %v775_v27 }
 0x21a   : > { %v3058_v45 = vpop.eup %3057  ;;  %2824 = vmatmul.mubr.bf16.gmra.mrb[20].mxu1 %v4049_v20  ;;  %v776_v58 = vmul.f32 %v3056_v56, %v3936_v36  ;;  %v774_v20 = vmul.f32 %v3054_v14, %v3921_v35  ;;  %v809_v30 = vmul.f32 %v3975_v32, %v771_v22  ;;  %v848_v35 = vadd.f32 %v3980_v55, %v810_v31 }
 0x21b   : > { %2827 = vmatprep.mubr.bf16.mxu1 %v869_v24  ;;  %v851_v37 = vadd.f32 %v3980_v55, %v813_v57  ;;  %v777_v15 = vmul.f32 %v3058_v45, %v3944_v40  ;;  %v3060_v63 = vpop.eup %3059 }
 0x21c   : > { %v814_v16 = vmul.f32 %v3975_v32, %v776_v58  ;;  %v773_v40 = vmul.f32 %v3060_v63, %v3917_v33  ;;  %v812_v48 = vmul.f32 %v3975_v32, %v774_v20 }
 0x21d   : > { %v3062_v59 = vpop.eup %3061  ;;  %v815_v11 = vmul.f32 %v3975_v32, %v777_v15 }
 0x21e   : > { %v3064_v26 = vpop.eup %3063  ;;  %1164 = vmatmul.mubr.bf16.gmra.mrb[24].mxu0 %v871_v9  ;;  %v852_v36 = vadd.f32 %v3980_v55, %v814_v16  ;;  %v778_v24 = vmul.f32 %v3062_v59, %v3948_v39  ;;  %v847_v39 = vadd.f32 %v3980_v55, %v809_v30  ;;  %v850_v1 = vadd.f32 %v3980_v55, %v812_v48 }
 0x21f   : > { %1173 = vmatprep.mubr.bf16.mxu0 %v3354_v54  ;;  %v853_v17 = vadd.f32 %v3980_v55, %v815_v11  ;;  %v779_v0 = vmul.f32 %v3064_v26, %v3956_v43  ;;  %v811_v43 = vmul.f32 %v3975_v32, %v773_v40 }
 0x220   : > { %v874_v2 = vpack.c.bf16 %v852_v36, %v851_v37  ;;  %v816_v3 = vmul.f32 %v3975_v32, %v778_v24  ;;  %v872_v12 = vpack.c.bf16 %v848_v35, %v847_v39 }
 0x221   : > { %v3066_v18 = vpop.eup %3065  ;;  %v817_v25 = vmul.f32 %v3975_v32, %v779_v0  ;;  %v849_v50 = vadd.f32 %v3980_v55, %v811_v43 }
 0x222   : > { %2828 = vmatmul.mubr.bf16.gmra.mrb[24].mxu1 %v870_v13  ;;  %v854_v7 = vadd.f32 %v3980_v55, %v816_v3  ;;  %v780_v33 = vmul.f32 %v3066_v18, %v3960_v42 }
 0x223   : > { %2831 = vmatprep.mubr.bf16.mxu1 %v871_v9  ;;  %v855_v29 = vadd.f32 %v3980_v55, %v817_v25  ;;  %v873_v42 = vpack.c.bf16 %v850_v1, %v849_v50 }
 0x224   : > { %v875_v52 = vpack.c.bf16 %v854_v7, %v853_v17  ;;  %v818_v49 = vmul.f32 %v3975_v32, %v780_v33  ;;  %v913_v32 = vld [vmem:[#allocation10] sm:$0x7] }
 0x226   : > { %1174 = vmatmul.mubr.bf16.gmra.mrb[28].mxu0 %v872_v12  ;;  %v856_v5 = vadd.f32 %v3980_v55, %v818_v49  ;;  %v4122_v55 = vunpack.c.l.bf16 %v913_v32 }
 0x227   : > { %1183 = vmatprep.mubr.bf16.mxu0 %v3354_v54 }
 0x228   : > { %v876_v19 = vpack.c.bf16 %v856_v5, %v855_v29  ;;  %v919_v8 = vrot.slane %v4122_v55, %v3971_v41 }
 0x22a   : > { %2832 = vmatmul.mubr.bf16.gmra.mrb[28].mxu1 %v872_v12  ;;  %v4129_v4 = vrot.slane %v919_v8, %v3971_v41 }
 0x22b   : > { %2835 = vmatprep.mubr.bf16.mxu1 %v873_v42 }
 0x22e   : > { %1184 = vmatmul.mubr.bf16.gmra.mrb[32].mxu0 %v873_v42 }
 0x22f   : > { %1193 = vmatprep.mubr.bf16.mxu0 %v3354_v54 }
 0x232   : > { %2836 = vmatmul.mubr.bf16.gmra.mrb[32].mxu1 %v874_v2 }
 0x233   : > { %2839 = vmatprep.mubr.bf16.mxu1 %v875_v52 }
 0x236   : > { %1194 = vmatmul.mubr.bf16.gmra.mrb[36].mxu0 %v874_v2 }
 0x237   : > { %1203 = vmatprep.mubr.bf16.mxu0 %v3354_v54 }
 0x23a   : > { %2840 = vmatmul.mubr.bf16.gmra.mrb[36].mxu1 %v876_v19 }
 0x23b   : > { %2843 = vmatprep.mubr.bf16.mxu1 %v3999_v38  ;;  %v923_v38 = vrot.slane %v4122_v55, %v922_v51 }
 0x23e   : > { %1204 = vmatmul.mubr.bf16.gmra.mrb[40].mxu0 %v875_v52 }
 0x23f   : > { %1213 = vmatprep.mubr.bf16.mxu0 %v3354_v54 }
 0x242   : > { %2844 = vmatmul.mubr.bf16.gmra.mrb[40].mxu1 %v4020_v61  ;;  %v4132_v61 = vrot.slane %v923_v38, %v3971_v41 }
 0x243   : > { %2847 = vmatprep.mubr.bf16.mxu1 %v4040_v34 }
 0x246   : > { %1214 = vmatmul.mubr.bf16.gmra.mrb[44].mxu0 %v876_v19 }
 0x24a   : > { %2848 = vmatmul.mubr.bf16.gmra.mrb[44].mxu1 %v4059_v10 }
 0x2c1   : > { %v1105_v54 = vpop.f32.mrb[0].mxu0 }
 0x2c2   : > { %v1106_v34 = vadd.f32 %v1105_v54, %v4129_v4  ;;  %v1107_v10 = vpop.f32.mrb[1].mxu0 }
 0x2c3   : > { %v1109_v13 = vpop.f32.mrb[2].mxu0  ;;  %v1108_v28 = vadd.f32 %v1107_v10, %v4132_v61 }
 0x2c4   : > { %v1110_v44 = vadd.f32 %v1109_v13, %v4129_v4  ;;  %v1111_v46 = vpop.f32.mrb[3].mxu0  ;;  %v1425_v53 = vmul.f32 0.17677669, %v1106_v34 }
 0x2c5   : > { %v1112_v23 = vadd.f32 %v1111_v46, %v4132_v61  ;;  %v1225_v21 = vpop.f32.mrb[0].mxu1 }
 0x2c6   : > { %v1426_v27 = vmul.f32 0.17677669, %v1110_v44  ;;  %v1226_v14 = vadd.f32 %v1225_v21, %v4129_v4  ;;  %v1227_v6 = vpop.f32.mrb[1].mxu1 }
 0x2c7   : > { %v2562_v62 = vpack.c.bf16 %v1112_v23, %v1108_v28  ;;  %v1229_v56 = vpop.f32.mrb[2].mxu1  ;;  %v1228_v22 = vadd.f32 %v1227_v6, %v4132_v61 }
 0x2c8   : > { %v2482_v57 = vpack.c.bf16 %v1426_v27, %v1425_v53  ;;  %v1230_v45 = vadd.f32 %v1229_v56, %v4129_v4  ;;  %v1231_v47 = vpop.f32.mrb[3].mxu1  ;;  %v1449_v15 = vmul.f32 0.17677669, %v1226_v14  ;;  %v926_v27 = vsub.s32 4, %v3968_v60 }
 0x2c9   : > { %2563 = vst [vmem:[%s4141_s30] sm:$0xff] %v2562_v62   ;;  %v1232_v58 = vadd.f32 %v1231_v47, %v4132_v61  ;;  %v1115_v37 = vpop.f32.mrb[4].mxu0 }
 0x2ca   : > { %2483 = vst [vmem:[%s4147_s9] sm:$0xff] %v2482_v57   ;;  %v1450_v63 = vmul.f32 0.17677669, %v1230_v45  ;;  %v1116_v9 = vadd.f32 %v1115_v37, %v4129_v4  ;;  %v1117_v31 = vpop.f32.mrb[5].mxu0 }
 0x2cb   : > { %v2622_v16 = vpack.c.bf16 %v1232_v58, %v1228_v22  ;;  %v1119_v59 = vpop.f32.mrb[6].mxu0  ;;  %v1118_v30 = vadd.f32 %v1117_v31, %v4132_v61 }
 0x2cc   : > { %v2542_v20 = vpack.c.bf16 %v1450_v63, %v1449_v15  ;;  %v1120_v11 = vadd.f32 %v1119_v59, %v4129_v4  ;;  %v1121_v26 = vpop.f32.mrb[7].mxu0  ;;  %v1427_v40 = vmul.f32 0.17677669, %v1116_v9  ;;  %v927_v63 = vrot.slane %v4122_v55, %v926_v27 }
 0x2cd   : > { %2760 = vst [vmem:[%s4141_s30 + $0x60] sm:$0xff] %v2622_v16   ;;  %v1122_v36 = vadd.f32 %v1121_v26, %v4132_v61  ;;  %v1235_v24 = vpop.f32.mrb[4].mxu1 }
 0x2ce   : > { %2745 = vst [vmem:[%s4147_s9 + $0x60] sm:$0xff] %v2542_v20   ;;  %v1428_v17 = vmul.f32 0.17677669, %v1120_v11  ;;  %v1236_v0 = vadd.f32 %v1235_v24, %v4129_v4  ;;  %v1237_v35 = vpop.f32.mrb[5].mxu1 }
 0x2cf   : > { %v2567_v2 = vpack.c.bf16 %v1122_v36, %v1118_v30  ;;  %v1239_v3 = vpop.f32.mrb[6].mxu1  ;;  %v1238_v39 = vadd.f32 %v1237_v35, %v4132_v61 }
 0x2d0   : > { %v2487_v18 = vpack.c.bf16 %v1428_v17, %v1427_v40  ;;  %v1240_v48 = vadd.f32 %v1239_v3, %v4129_v4  ;;  %v1241_v25 = vpop.f32.mrb[7].mxu1  ;;  %v1451_v43 = vmul.f32 0.17677669, %v1236_v0  ;;  %v4190_v3 = vrot.slane %v927_v63, %v3971_v41 }
 0x2d1   : > { %2749 = vst [vmem:[%s4141_s30 + $0x8] sm:$0xff] %v2567_v2   ;;  %v1242_v7 = vadd.f32 %v1241_v25, %v4132_v61  ;;  %v1125_v33 = vpop.f32.mrb[8].mxu0 }
 0x2d2   : > { %2734 = vst [vmem:[%s4147_s9 + $0x8] sm:$0xff] %v2487_v18   ;;  %v1452_v29 = vmul.f32 0.17677669, %v1240_v48  ;;  %v1126_v12 = vadd.f32 %v1125_v33, %v4129_v4  ;;  %v1127_v52 = vpop.f32.mrb[9].mxu0 }
 0x2d3   : > { %v2627_v49 = vpack.c.bf16 %v1242_v7, %v1238_v39  ;;  %v1129_v1 = vpop.f32.mrb[10].mxu0  ;;  %v1128_v42 = vadd.f32 %v1127_v52, %v4132_v61 }
 0x2d4   : > { %v2547_v5 = vpack.c.bf16 %v1452_v29, %v1451_v43  ;;  %v1130_v50 = vadd.f32 %v1129_v1, %v4129_v4  ;;  %v1131_v19 = vpop.f32.mrb[11].mxu0  ;;  %v1429_v8 = vmul.f32 0.17677669, %v1126_v12 }
 0x2d5   : > { %2761 = vst [vmem:[%s4141_s30 + $0x68] sm:$0xff] %v2627_v49   ;;  %v1132_v32 = vadd.f32 %v1131_v19, %v4132_v61  ;;  %v1245_v51 = vpop.f32.mrb[8].mxu1 }
 0x2d6   : > { %2746 = vst [vmem:[%s4147_s9 + $0x68] sm:$0xff] %v2547_v5   ;;  %v1430_v38 = vmul.f32 0.17677669, %v1130_v50  ;;  %v1246_v54 = vadd.f32 %v1245_v51, %v4129_v4  ;;  %v1247_v34 = vpop.f32.mrb[9].mxu1 }
 0x2d7   : > { %v2572_v10 = vpack.c.bf16 %v1132_v32, %v1128_v42  ;;  %v1249_v13 = vpop.f32.mrb[10].mxu1  ;;  %v1248_v23 = vadd.f32 %v1247_v34, %v4132_v61 }
 0x2d8   : > { %v2492_v44 = vpack.c.bf16 %v1430_v38, %v1429_v8  ;;  %v1250_v46 = vadd.f32 %v1249_v13, %v4129_v4  ;;  %v1251_v28 = vpop.f32.mrb[11].mxu1  ;;  %v1453_v14 = vmul.f32 0.17677669, %v1246_v54 }
 0x2d9   : > { %2750 = vst [vmem:[%s4141_s30 + $0x10] sm:$0xff] %v2572_v10   ;;  %v1252_v21 = vadd.f32 %v1251_v28, %v4132_v61  ;;  %v1135_v53 = vpop.f32.mrb[12].mxu0 }
 0x2da   : > { %2735 = vst [vmem:[%s4147_s9 + $0x10] sm:$0xff] %v2492_v44   ;;  %v1454_v6 = vmul.f32 0.17677669, %v1250_v46  ;;  %v1136_v62 = vadd.f32 %v1135_v53, %v4129_v4  ;;  %v1137_v56 = vpop.f32.mrb[13].mxu0 }
 0x2db   : > { %v2632_v57 = vpack.c.bf16 %v1252_v21, %v1248_v23  ;;  %v1139_v45 = vpop.f32.mrb[14].mxu0  ;;  %v1138_v37 = vadd.f32 %v1137_v56, %v4132_v61 }
 0x2dc   : > { %v2552_v47 = vpack.c.bf16 %v1454_v6, %v1453_v14  ;;  %v1140_v22 = vadd.f32 %v1139_v45, %v4129_v4  ;;  %v1141_v58 = vpop.f32.mrb[15].mxu0  ;;  %v1431_v9 = vmul.f32 0.17677669, %v1136_v62 }
 0x2dd   : > { %2762 = vst [vmem:[%s4141_s30 + $0x70] sm:$0xff] %v2632_v57   ;;  %v1142_v15 = vadd.f32 %v1141_v58, %v4132_v61  ;;  %v1255_v60 = vpop.f32.mrb[12].mxu1 }
 0x2de   : > { %2747 = vst [vmem:[%s4147_s9 + $0x70] sm:$0xff] %v2552_v47   ;;  %v1432_v31 = vmul.f32 0.17677669, %v1140_v22  ;;  %v1256_v16 = vadd.f32 %v1255_v60, %v4129_v4  ;;  %v1257_v59 = vpop.f32.mrb[13].mxu1 }
 0x2df   : > { %v2577_v20 = vpack.c.bf16 %v1142_v15, %v1138_v37  ;;  %v1259_v11 = vpop.f32.mrb[14].mxu1  ;;  %v1258_v24 = vadd.f32 %v1257_v59, %v4132_v61 }
 0x2e0   : > { %v2497_v26 = vpack.c.bf16 %v1432_v31, %v1431_v9  ;;  %v1260_v30 = vadd.f32 %v1259_v11, %v4129_v4  ;;  %v1261_v36 = vpop.f32.mrb[15].mxu1  ;;  %v1455_v55 = vmul.f32 0.17677669, %v1256_v16 }
 0x2e1   : > { %2751 = vst [vmem:[%s4141_s30 + $0x18] sm:$0xff] %v2577_v20   ;;  %v1262_v40 = vadd.f32 %v1261_v36, %v4132_v61  ;;  %v1145_v17 = vpop.f32.mrb[16].mxu0 }
 0x2e2   : > { %2736 = vst [vmem:[%s4147_s9 + $0x18] sm:$0xff] %v2497_v26   ;;  %v1456_v0 = vmul.f32 0.17677669, %v1260_v30  ;;  %v1146_v35 = vadd.f32 %v1145_v17, %v4129_v4  ;;  %v1147_v2 = vpop.f32.mrb[17].mxu0 }
 0x2e3   : > { %v2637_v18 = vpack.c.bf16 %v1262_v40, %v1258_v24  ;;  %v1149_v48 = vpop.f32.mrb[18].mxu0  ;;  %v1148_v33 = vadd.f32 %v1147_v2, %v4132_v61 }
 0x2e4   : > { %v2557_v25 = vpack.c.bf16 %v1456_v0, %v1455_v55  ;;  %v1150_v39 = vadd.f32 %v1149_v48, %v4129_v4  ;;  %v1151_v7 = vpop.f32.mrb[19].mxu0  ;;  %v1433_v12 = vmul.f32 0.17677669, %v1146_v35 }
 0x2e5   : > { %2763 = vst [vmem:[%s4141_s30 + $0x78] sm:$0xff] %v2637_v18   ;;  %v1152_v43 = vadd.f32 %v1151_v7, %v4132_v61  ;;  %v2821_v29 = vpop.f32.mrb[16].mxu1 }
 0x2e6   : > { %2748 = vst [vmem:[%s4147_s9 + $0x78] sm:$0xff] %v2557_v25   ;;  %v1434_v52 = vmul.f32 0.17677669, %v1150_v39  ;;  %v1307_v41 = vadd.f32 %v2821_v29, %v4190_v3  ;;  %v1298_v49 = vpop.f32.mrb[17].mxu1 }
 0x2e7   : > { %v2582_v1 = vpack.c.bf16 %v1152_v43, %v1148_v33  ;;  %v1299_v5 = vadd.f32 %v1298_v49, %v4190_v3  ;;  %v2822_v50 = vpop.f32.mrb[18].mxu1 }
 0x2e8   : > { %v2502_v19 = vpack.c.bf16 %v1434_v52, %v1433_v12  ;;  %v1310_v42 = vadd.f32 %v2822_v50, %v4190_v3  ;;  %v1301_v32 = vpop.f32.mrb[19].mxu1 }
 0x2e9   : > { %2752 = vst [vmem:[%s4141_s30 + $0x20] sm:$0xff] %v2582_v1   ;;  %v1302_v51 = vadd.f32 %v1301_v32, %v4190_v3  ;;  %v1155_v8 = vpop.f32.mrb[20].mxu0 }
 0x2ea   : > { %2737 = vst [vmem:[%s4147_s9 + $0x20] sm:$0xff] %v2502_v19   ;;  %v2647_v38 = vpack.c.bf16 %v1310_v42, %v1307_v41  ;;  %v1156_v54 = vadd.f32 %v1155_v8, %v4129_v4  ;;  %v1157_v34 = vpop.f32.mrb[21].mxu0 }
 0x2eb   : > { %v2642_v10 = vpack.c.bf16 %v1302_v51, %v1299_v5  ;;  %v1159_v13 = vpop.f32.mrb[22].mxu0  ;;  %v1158_v28 = vadd.f32 %v1157_v34, %v4132_v61 }
 0x2ec   : > { %2764 = vst [vmem:[%s4205_s19 + $0x8] sm:$0xff] %v2647_v38   ;;  %v1160_v44 = vadd.f32 %v1159_v13, %v4129_v4  ;;  %v1161_v46 = vpop.f32.mrb[23].mxu0  ;;  %v1435_v53 = vmul.f32 0.17677669, %v1156_v54 }
 0x2ed   : > { %2643 = vst [vmem:[%s4205_s19] sm:$0xff] %v2642_v10   ;;  %v1162_v23 = vadd.f32 %v1161_v46, %v4132_v61  ;;  %v2825_v21 = vpop.f32.mrb[20].mxu1 }
 0x2ee   : > { %v1436_v27 = vmul.f32 0.17677669, %v1160_v44  ;;  %v1323_v14 = vadd.f32 %v2825_v21, %v4190_v3  ;;  %v1314_v6 = vpop.f32.mrb[21].mxu1 }
 0x2ef   : > { %v2587_v62 = vpack.c.bf16 %v1162_v23, %v1158_v28  ;;  %v1315_v56 = vadd.f32 %v1314_v6, %v4190_v3  ;;  %v2826_v57 = vpop.f32.mrb[22].mxu1 }
 0x2f0   : > { %v2507_v45 = vpack.c.bf16 %v1436_v27, %v1435_v53  ;;  %v1326_v47 = vadd.f32 %v2826_v57, %v4190_v3  ;;  %v1317_v22 = vpop.f32.mrb[23].mxu1 }
 0x2f1   : > { %2753 = vst [vmem:[%s4141_s30 + $0x28] sm:$0xff] %v2587_v62   ;;  %v1318_v58 = vadd.f32 %v1317_v22, %v4190_v3  ;;  %v1165_v37 = vpop.f32.mrb[24].mxu0 }
 0x2f2   : > { %2738 = vst [vmem:[%s4147_s9 + $0x28] sm:$0xff] %v2507_v45   ;;  %v2657_v15 = vpack.c.bf16 %v1326_v47, %v1323_v14  ;;  %v1166_v60 = vadd.f32 %v1165_v37, %v4129_v4  ;;  %v1167_v63 = vpop.f32.mrb[25].mxu0 }
 0x2f3   : > { %v2652_v9 = vpack.c.bf16 %v1318_v58, %v1315_v56  ;;  %v1169_v31 = vpop.f32.mrb[26].mxu0  ;;  %v1168_v20 = vadd.f32 %v1167_v63, %v4132_v61 }
 0x2f4   : > { %2766 = vst [vmem:[%s4205_s19 + $0x18] sm:$0xff] %v2657_v15   ;;  %v1170_v16 = vadd.f32 %v1169_v31, %v4129_v4  ;;  %v1171_v59 = vpop.f32.mrb[27].mxu0  ;;  %v1437_v30 = vmul.f32 0.17677669, %v1166_v60 }
 0x2f5   : > { %2765 = vst [vmem:[%s4205_s19 + $0x10] sm:$0xff] %v2652_v9   ;;  %v1172_v11 = vadd.f32 %v1171_v59, %v4132_v61  ;;  %v2829_v26 = vpop.f32.mrb[24].mxu1 }
 0x2f6   : > { %v1438_v36 = vmul.f32 0.17677669, %v1170_v16  ;;  %v1339_v24 = vadd.f32 %v2829_v26, %v4190_v3  ;;  %v1330_v40 = vpop.f32.mrb[25].mxu1 }
 0x2f7   : > { %v2592_v17 = vpack.c.bf16 %v1172_v11, %v1168_v20  ;;  %v1331_v55 = vadd.f32 %v1330_v40, %v4190_v3  ;;  %v2830_v0 = vpop.f32.mrb[26].mxu1 }
 0x2f8   : > { %v2512_v35 = vpack.c.bf16 %v1438_v36, %v1437_v30  ;;  %v1342_v2 = vadd.f32 %v2830_v0, %v4190_v3  ;;  %v1333_v18 = vpop.f32.mrb[27].mxu1 }
 0x2f9   : > { %2754 = vst [vmem:[%s4141_s30 + $0x30] sm:$0xff] %v2592_v17   ;;  %v1334_v48 = vadd.f32 %v1333_v18, %v4190_v3  ;;  %v1175_v25 = vpop.f32.mrb[28].mxu0 }
 0x2fa   : > { %2739 = vst [vmem:[%s4147_s9 + $0x30] sm:$0xff] %v2512_v35   ;;  %v2667_v39 = vpack.c.bf16 %v1342_v2, %v1339_v24  ;;  %v1176_v7 = vadd.f32 %v1175_v25, %v4129_v4  ;;  %v1177_v33 = vpop.f32.mrb[29].mxu0 }
 0x2fb   : > { %v2662_v43 = vpack.c.bf16 %v1334_v48, %v1331_v55  ;;  %v1179_v29 = vpop.f32.mrb[30].mxu0  ;;  %v1178_v41 = vadd.f32 %v1177_v33, %v4132_v61 }
 0x2fc   : > { %2768 = vst [vmem:[%s4205_s19 + $0x28] sm:$0xff] %v2667_v39   ;;  %v1180_v12 = vadd.f32 %v1179_v29, %v4129_v4  ;;  %v1181_v52 = vpop.f32.mrb[31].mxu0  ;;  %v1439_v5 = vmul.f32 0.17677669, %v1176_v7 }
 0x2fd   : > { %2767 = vst [vmem:[%s4205_s19 + $0x20] sm:$0xff] %v2662_v43   ;;  %v1182_v49 = vadd.f32 %v1181_v52, %v4132_v61  ;;  %v2833_v1 = vpop.f32.mrb[28].mxu1 }
 0x2fe   : > { %v1440_v50 = vmul.f32 0.17677669, %v1180_v12  ;;  %v1355_v19 = vadd.f32 %v2833_v1, %v4190_v3  ;;  %v1346_v42 = vpop.f32.mrb[29].mxu1 }
 0x2ff   : > { %v2597_v32 = vpack.c.bf16 %v1182_v49, %v1178_v41  ;;  %v1347_v51 = vadd.f32 %v1346_v42, %v4190_v3  ;;  %v2834_v8 = vpop.f32.mrb[30].mxu1 }
 0x300   : > { %v2517_v38 = vpack.c.bf16 %v1440_v50, %v1439_v5  ;;  %v1358_v54 = vadd.f32 %v2834_v8, %v4190_v3  ;;  %v1349_v34 = vpop.f32.mrb[31].mxu1 }
 0x301   : > { %2755 = vst [vmem:[%s4141_s30 + $0x38] sm:$0xff] %v2597_v32   ;;  %v1350_v10 = vadd.f32 %v1349_v34, %v4190_v3  ;;  %v1185_v13 = vpop.f32.mrb[32].mxu0 }
 0x302   : > { %2740 = vst [vmem:[%s4147_s9 + $0x38] sm:$0xff] %v2517_v38   ;;  %v2677_v44 = vpack.c.bf16 %v1358_v54, %v1355_v19  ;;  %v1186_v46 = vadd.f32 %v1185_v13, %v4129_v4  ;;  %v1187_v28 = vpop.f32.mrb[33].mxu0 }
 0x303   : > { %v2672_v23 = vpack.c.bf16 %v1350_v10, %v1347_v51  ;;  %v1189_v21 = vpop.f32.mrb[34].mxu0  ;;  %v1188_v14 = vadd.f32 %v1187_v28, %v4132_v61 }
 0x304   : > { %2770 = vst [vmem:[%s4205_s19 + $0x38] sm:$0xff] %v2677_v44   ;;  %v1190_v53 = vadd.f32 %v1189_v21, %v4129_v4  ;;  %v1191_v27 = vpop.f32.mrb[35].mxu0  ;;  %v1441_v56 = vmul.f32 0.17677669, %v1186_v46 }
 0x305   : > { %2769 = vst [vmem:[%s4205_s19 + $0x30] sm:$0xff] %v2672_v23   ;;  %v1192_v6 = vadd.f32 %v1191_v27, %v4132_v61  ;;  %v2837_v62 = vpop.f32.mrb[32].mxu1 }
 0x306   : > { %v1442_v57 = vmul.f32 0.17677669, %v1190_v53  ;;  %v1371_v45 = vadd.f32 %v2837_v62, %v4190_v3  ;;  %v1362_v47 = vpop.f32.mrb[33].mxu1 }
 0x307   : > { %v2602_v22 = vpack.c.bf16 %v1192_v6, %v1188_v14  ;;  %v1363_v58 = vadd.f32 %v1362_v47, %v4190_v3  ;;  %v2838_v37 = vpop.f32.mrb[34].mxu1 }
 0x308   : > { %v2522_v15 = vpack.c.bf16 %v1442_v57, %v1441_v56  ;;  %v1374_v60 = vadd.f32 %v2838_v37, %v4190_v3  ;;  %v1365_v63 = vpop.f32.mrb[35].mxu1 }
 0x309   : > { %2756 = vst [vmem:[%s4141_s30 + $0x40] sm:$0xff] %v2602_v22   ;;  %v1366_v9 = vadd.f32 %v1365_v63, %v4190_v3  ;;  %v1195_v31 = vpop.f32.mrb[36].mxu0 }
 0x30a   : > { %2741 = vst [vmem:[%s4147_s9 + $0x40] sm:$0xff] %v2522_v15   ;;  %v2687_v16 = vpack.c.bf16 %v1374_v60, %v1371_v45  ;;  %v1196_v59 = vadd.f32 %v1195_v31, %v4129_v4  ;;  %v1197_v20 = vpop.f32.mrb[37].mxu0 }
 0x30b   : > { %v2682_v11 = vpack.c.bf16 %v1366_v9, %v1363_v58  ;;  %v1199_v26 = vpop.f32.mrb[38].mxu0  ;;  %v1198_v24 = vadd.f32 %v1197_v20, %v4132_v61 }
 0x30c   : > { %2772 = vst [vmem:[%s4205_s19 + $0x48] sm:$0xff] %v2687_v16   ;;  %v1200_v30 = vadd.f32 %v1199_v26, %v4129_v4  ;;  %v1201_v36 = vpop.f32.mrb[39].mxu0  ;;  %v1443_v55 = vmul.f32 0.17677669, %v1196_v59 }
 0x30d   : > { %2771 = vst [vmem:[%s4205_s19 + $0x40] sm:$0xff] %v2682_v11   ;;  %v1202_v40 = vadd.f32 %v1201_v36, %v4132_v61  ;;  %v2841_v17 = vpop.f32.mrb[36].mxu1 }
 0x30e   : > { %v1444_v0 = vmul.f32 0.17677669, %v1200_v30  ;;  %v1387_v35 = vadd.f32 %v2841_v17, %v4190_v3  ;;  %v1378_v2 = vpop.f32.mrb[37].mxu1 }
 0x30f   : > { %v2607_v18 = vpack.c.bf16 %v1202_v40, %v1198_v24  ;;  %v1379_v48 = vadd.f32 %v1378_v2, %v4190_v3  ;;  %v2842_v25 = vpop.f32.mrb[38].mxu1 }
 0x310   : > { %v2527_v39 = vpack.c.bf16 %v1444_v0, %v1443_v55  ;;  %v1390_v7 = vadd.f32 %v2842_v25, %v4190_v3  ;;  %v1381_v33 = vpop.f32.mrb[39].mxu1 }
 0x311   : > { %2757 = vst [vmem:[%s4141_s30 + $0x48] sm:$0xff] %v2607_v18   ;;  %v1382_v43 = vadd.f32 %v1381_v33, %v4190_v3  ;;  %v1205_v29 = vpop.f32.mrb[40].mxu0 }
 0x312   : > { %2742 = vst [vmem:[%s4147_s9 + $0x48] sm:$0xff] %v2527_v39   ;;  %v2697_v12 = vpack.c.bf16 %v1390_v7, %v1387_v35  ;;  %v1206_v52 = vadd.f32 %v1205_v29, %v4129_v4  ;;  %v1207_v41 = vpop.f32.mrb[41].mxu0 }
 0x313   : > { %v2692_v49 = vpack.c.bf16 %v1382_v43, %v1379_v48  ;;  %v1209_v1 = vpop.f32.mrb[42].mxu0  ;;  %v1208_v19 = vadd.f32 %v1207_v41, %v4132_v61 }
 0x314   : > { %2774 = vst [vmem:[%s4205_s19 + $0x58] sm:$0xff] %v2697_v12   ;;  %v1210_v5 = vadd.f32 %v1209_v1, %v4129_v4  ;;  %v1211_v50 = vpop.f32.mrb[43].mxu0  ;;  %v1445_v51 = vmul.f32 0.17677669, %v1206_v52 }
 0x315   : > { %2773 = vst [vmem:[%s4205_s19 + $0x50] sm:$0xff] %v2692_v49   ;;  %v1212_v42 = vadd.f32 %v1211_v50, %v4132_v61  ;;  %v2845_v32 = vpop.f32.mrb[40].mxu1 }
 0x316   : > { %v1446_v8 = vmul.f32 0.17677669, %v1210_v5  ;;  %v1403_v38 = vadd.f32 %v2845_v32, %v4190_v3  ;;  %v1394_v54 = vpop.f32.mrb[41].mxu1 }
 0x317   : > { %v2612_v34 = vpack.c.bf16 %v1212_v42, %v1208_v19  ;;  %v1395_v10 = vadd.f32 %v1394_v54, %v4190_v3  ;;  %v2846_v13 = vpop.f32.mrb[42].mxu1 }
 0x318   : > { %v2532_v44 = vpack.c.bf16 %v1446_v8, %v1445_v51  ;;  %v1406_v46 = vadd.f32 %v2846_v13, %v4190_v3  ;;  %v1397_v28 = vpop.f32.mrb[43].mxu1 }
 0x319   : > { %2758 = vst [vmem:[%s4141_s30 + $0x50] sm:$0xff] %v2612_v34   ;;  %v1398_v23 = vadd.f32 %v1397_v28, %v4190_v3  ;;  %v1215_v21 = vpop.f32.mrb[44].mxu0 }
 0x31a   : > { %2743 = vst [vmem:[%s4147_s9 + $0x50] sm:$0xff] %v2532_v44   ;;  %v2707_v53 = vpack.c.bf16 %v1406_v46, %v1403_v38  ;;  %v1216_v27 = vadd.f32 %v1215_v21, %v4129_v4  ;;  %v1217_v14 = vpop.f32.mrb[45].mxu0 }
 0x31b   : > { %v2702_v6 = vpack.c.bf16 %v1398_v23, %v1395_v10  ;;  %v1219_v62 = vpop.f32.mrb[46].mxu0  ;;  %v1218_v45 = vadd.f32 %v1217_v14, %v4132_v61 }
 0x31c   : > { %2776 = vst [vmem:[%s4205_s19 + $0x68] sm:$0xff] %v2707_v53   ;;  %v1220_v56 = vadd.f32 %v1219_v62, %v4129_v4  ;;  %v1221_v57 = vpop.f32.mrb[47].mxu0  ;;  %v1447_v58 = vmul.f32 0.17677669, %v1216_v27 }
 0x31d   : > { %2775 = vst [vmem:[%s4205_s19 + $0x60] sm:$0xff] %v2702_v6   ;;  %v1222_v47 = vadd.f32 %v1221_v57, %v4132_v61  ;;  %v2849_v22 = vpop.f32.mrb[44].mxu1 }
 0x31e   : > { %v1448_v37 = vmul.f32 0.17677669, %v1220_v56  ;;  %v4289_v15 = vadd.f32 %v2849_v22, %v4190_v3  ;;  %v1410_v60 = vpop.f32.mrb[45].mxu1 }
 0x31f   : > { %v2617_v4 = vpack.c.bf16 %v1222_v47, %v1218_v45  ;;  %v4298_v61 = vadd.f32 %v1410_v60, %v4190_v3  ;;  %v2850_v63 = vpop.f32.mrb[46].mxu1 }
 0x320   : > { %v2537_v9 = vpack.c.bf16 %v1448_v37, %v1447_v58  ;;  %v4303_v31 = vadd.f32 %v2850_v63, %v4190_v3  ;;  %v1413_v16 = vpop.f32.mrb[47].mxu1 }
 0x321   : > { %2759 = vst [vmem:[%s4141_s30 + $0x58] sm:$0xff] %v2617_v4   ;;  %v4314_v59 = vadd.f32 %v1413_v16, %v4190_v3  ;;  %s3355_s30 = smov [#allocation12]  }
 0x322   : > { %2744 = vst [vmem:[%s4147_s9 + $0x58] sm:$0xff] %v2537_v9   ;;  %v2717_v20 = vpack.c.bf16 %v4303_v31, %v4289_v15  ;;  %s3213_s2 = sshll.u32 %s3355_s30, 4  ;;  %s3214_s2 = int_to_ptr.vmem [resolvable:$false] %s3213_s2 }
 0x323   : > { %s3215_s13 = scalar_lea.vmem %s3214_s2, 4096  ;;  %p3216_p3 = scmp.lt.s32.totalorder %s4300_s18, %s3214_s2 }
 0x324   : > { %p3217_p7 = scmp.lt.s32.totalorder %s3215_s13, %s3209_s1 }
 0x326   : > { %p3218_p10 = por %p3217_p7, %p3216_p3 }
 0x328   : > { %p3219_p13 = pnand %p3218_p10, %p3212_p8 }
 0x32a   : > { %3222 = shalt.err (!%p3219_p13)
}
 0x32b   : > { %s3223_s28 = scalar_lea.hbm %s4294_s20, 2048  ;;  %s3227_s29 = scalar_lea.hbm %s4437_s6, 4096 }
 0x32c   : > { %p3224_p0 = scmp.ne.s32.totalorder %s4294_s20, %s3223_s28  ;;  %p3228_p9 = scmp.lt.u32.totalorder %s4294_s20, %s4437_s6 }
 0x32d   : > { %p3229_p12 = scmp.lt.u32.totalorder %s3227_s29, %s3223_s28  ;;  %p3231_p4 = scmp.lt.u32.totalorder %s3223_s28, %s4294_s20 }
 0x32e   : > { %p3225_p5 = pnand %p3224_p0, %p3554_p1 }
 0x32f   : > { %p3230_p2 = por %p3229_p12, %p3228_p9 }
 0x330   : > { %p3226_p11 = pneg %p3225_p5 }
 0x331   : > { %p3232_p6 = por %p3231_p4, %p3230_p2 }
 0x333   : > { %p3233_p8 = pnand %p3232_p6, %p3226_p11 }
 0x335   : > { %3236 = shalt.err (!%p3233_p8)
}
 0x336   : > { %s3356_s1 = smov 64   ;;  %s3357_s30 = smov 4   ;;  %v2712_v3 = vpack.c.bf16 %v4314_v59, %v4298_v61 }
 0x337   : > { %2886 = dma.vmem_to_hbm [thread:$0]  (%p3554_p1), %s4300_s18, 2048, %s4294_s20, %s4328_s16, %s3356_s1, %s3356_s1, %s3357_s30  }
 0x338   : > { %s1938_s13 = scalar_lea.sflag [#allocation4], %s3606_s15  ;;  %s3237_s28 = scalar_lea.vmem %s4310_s14, 2048 }
 0x339   : > { %p3238_p3 = scmp.ne.s32.totalorder %s4310_s14, %s3237_s28  ;;  %s3358_s9 = smov [#allocation11]  }
 0x33a   : > { %s3241_s17 = sshll.u32 %s3358_s9, 4  ;;  %s3242_s17 = int_to_ptr.vmem [resolvable:$false] %s3241_s17 }
 0x33b   : > { %p3239_p7 = pnand %p3238_p3, %p3554_p1  ;;  %s3243_s29 = scalar_lea.vmem %s3242_s17, 4096 }
 0x33c   : > { %p3244_p13 = scmp.lt.s32.totalorder %s4310_s14, %s3242_s17  ;;  %p3245_p0 = scmp.lt.s32.totalorder %s3243_s29, %s3237_s28 }
 0x33d   : > { %p3240_p10 = pneg %p3239_p7 }
 0x33e   : > { %p3246_p5 = por %p3245_p0, %p3244_p13 }
 0x340   : > { %p3247_p11 = pnand %p3246_p5, %p3240_p10 }
 0x342   : > { %3250 = shalt.err (!%p3247_p11)
}
 0x343   : > { %s3251_s18 = scalar_lea.hbm %s4308_s12, 2048  ;;  %s3255_s2 = scalar_lea.hbm %s4436_s5, 4096 }
 0x344   : > { %p3252_p9 = scmp.ne.s32.totalorder %s4308_s12, %s3251_s18  ;;  %p3256_p4 = scmp.lt.u32.totalorder %s4308_s12, %s4436_s5 }
 0x345   : > { %p3257_p6 = scmp.lt.u32.totalorder %s3255_s2, %s3251_s18  ;;  %p3259_p3 = scmp.lt.u32.totalorder %s3251_s18, %s4308_s12 }
 0x346   : > { %p3253_p12 = pnand %p3252_p9, %p3554_p1 }
 0x347   : > { %p3258_p8 = por %p3257_p6, %p3256_p4 }
 0x348   : > { %p3254_p2 = pneg %p3253_p12 }
 0x349   : > { %p3260_p7 = por %p3259_p3, %p3258_p8 }
 0x34b   : > { %p3261_p10 = pnand %p3260_p7, %p3254_p2 }
 0x34d   : > { %3264 = shalt.err (!%p3261_p10)
}
 0x34e   : > { %2885 = dma.vmem_to_hbm [thread:$0]  (%p3554_p1), %s4310_s14, 2048, %s4308_s12, %s1938_s13, %s3356_s1, %s3356_s1, %s3357_s30  }
 0x34f   : > { %2778 = vst [vmem:[%s4205_s19 + $0x78] sm:$0xff] %v2717_v20   ;;  %2777 = vst [vmem:[%s4205_s19 + $0x70] sm:$0xff] %v2712_v3   ;;  %s3265_s28 = scalar_lea.vmem %s4321_s11, 2048  ;;  %s3359_s29 = smov [#allocation14]  }
 0x350   : > { %p3266_p13 = scmp.ne.s32.totalorder %s4321_s11, %s3265_s28  ;;  %s3269_s18 = sshll.u32 %s3359_s29, 4  ;;  %s3270_s18 = int_to_ptr.vmem [resolvable:$false] %s3269_s18 }
 0x351   : > { %s3271_s15 = scalar_lea.vmem %s3270_s18, 4096  ;;  %p3272_p11 = scmp.lt.s32.totalorder %s4321_s11, %s3270_s18 }
 0x352   : > { %p3267_p0 = pnand %p3266_p13, %p3554_p1  ;;  %p3273_p9 = scmp.lt.s32.totalorder %s3271_s15, %s3265_s28 }
 0x354   : > { %p3268_p5 = pneg %p3267_p0  ;;  %p3274_p12 = por %p3273_p9, %p3272_p11 }
 0x356   : > { %p3275_p2 = pnand %p3274_p12, %p3268_p5 }
 0x358   : > { %3278 = shalt.err (!%p3275_p2)
}
 0x359   : > { %s3279_s19 = scalar_lea.hbm %s4319_s0, 2048  ;;  %s3283_s13 = scalar_lea.hbm %s4438_s7, 4096 }
 0x35a   : > { %p3280_p4 = scmp.ne.s32.totalorder %s4319_s0, %s3279_s19  ;;  %p3284_p3 = scmp.lt.u32.totalorder %s4319_s0, %s4438_s7 }
 0x35b   : > { %p3285_p7 = scmp.lt.u32.totalorder %s3283_s13, %s3279_s19  ;;  %p3287_p13 = scmp.lt.u32.totalorder %s3279_s19, %s4319_s0 }
 0x35c   : > { %p3281_p6 = pnand %p3280_p4, %p3554_p1 }
 0x35d   : > { %p3286_p10 = por %p3285_p7, %p3284_p3 }
 0x35e   : > { %p3282_p8 = pneg %p3281_p6 }
 0x35f   : > { %p3288_p0 = por %p3287_p13, %p3286_p10 }
 0x361   : > { %p3289_p5 = pnand %p3288_p0, %p3282_p8 }
 0x363   : > { %3292 = shalt.err (!%p3289_p5)
}
 0x364   : > { %2887 = dma.vmem_to_hbm [thread:$0]  (%p3554_p1), %s4321_s11, 2048, %s4319_s0, %s4328_s16, %s3356_s1, %s3356_s1, %s3357_s30  }
 0x365 PF: > { %s2008_s2 = sand.u32 1, %s3331_s24   ;;  %p4464_p11 = scmp.ne.s32.totalorder %s4447_s8, 0 }
 0x366   : > { %p4465_p9 = scmp.ge.s32.totalorder %s3343_s27, 2  ;;  %s2009_s9 = scalar_lea.sflag [#allocation4], %s2008_s2 }
 0x368   : > { %p2909_p12 = pnand %p4465_p9, %p4464_p11 }
 0x36a   : > { %3322 = dma.done.wait (!%p2909_p12), %s2009_s9, 2048  }
 0x36b   : > { %3324 = vsyncadd (!%p2909_p12), %s2009_s9, 4294965248  ;;  %s4466_s21 = sadd.s32 4294967294, %s3343_s27  }
 0x36c   : > { %s2017_s17 = sand.u32 1, %s4466_s21  }
 0x36d   : > { %s2018_s28 = scalar_lea.sflag [#allocation13], %s2017_s17 }
 0x36e   : > { %3326 = dma.done.wait (!%p2909_p12), %s2018_s28, 4096  }
 0x36f   : > { %3328 = vsyncadd (!%p2909_p12), %s2018_s28, 4294963200  ;;  %p26_p1 = scmp.ge.s32.totalorder %s3544_s22, 4   ;;  %s4467_s24 = smov %s3335_s25 }
 0x370   : > { %s4468_s25 = smov %s3339_s26  ;;  %s4469_s26 = smov %s3560_s23 }
 0x371   : > { %s4470_s27 = smov %s3544_s22  ;;  %28 = sbr.rel (!%p26_p1) target bundleno = 13 (0xd), region = 133 }
 0x378   :  { %2032 = vsyncpa [#allocation3], 1 }
 0x379   :  { %2034 = vsyncpa [#allocation3 + $0x1], 1 }
 0x37a   :  { %2035 = vsyncpa [#allocation6], 1 }
 0x37b   :  { %2036 = vsyncpa [#allocation9], 1 }
 0x37c   :  { %2037 = vsyncpa [#allocation4], 1 }
 0x37d   :  { %2039 = vsyncpa [#allocation4 + $0x1], 1 }
 0x37e   :  { %2040 = vsyncpa [#allocation13], 1 }
 0x37f   :  { %2042 = vsyncpa [#allocation13 + $0x1], 1 }

</bundles_post_ra>
